<compile_context>
chip_gen: v7x
topology: tpu7x:2x2x1
jax: 0.10.0
libtpu: 0.0.40
codegen_flags: <defaults>
</compile_context>

<pallas_src>
import functools

import jax
import jax.numpy as jnp
from jax.experimental import pallas as pl
from jax.experimental.pallas import tpu as pltpu


def _fused_upstream_kernel(x_ref, w1_ref, b1_ref, w2s_ref, w2n_ref, b2_ref,
                           o_ref, *, ds):
    """One row-tile of frames -> concatenated [speech | sound] features."""
    x = x_ref[...].astype(jnp.bfloat16)                 # in-kernel cast (free)

    # Fused stage 1 of both upstreams: one matmul + one GELU over (TM, Ds+Dn).
    h = jnp.dot(x, w1_ref[...], preferred_element_type=jnp.float32)
    h = h + b1_ref[...]                                  # (1, Dout) broadcast
    # NOTE: torch nn.GELU() default is the exact erf form; the tanh
    # approximation is used for guaranteed Mosaic/EUP lowering (error << bf16).
    h = jax.nn.gelu(h, approximate=True)
    hb = h.astype(jnp.bfloat16)

    # Stage 2: two 128-wide matmuls on contiguous lane groups (v5e-native).
    ys = jnp.dot(hb[:, :ds], w2s_ref[...], preferred_element_type=jnp.float32)
    yn = jnp.dot(hb[:, ds:], w2n_ref[...], preferred_element_type=jnp.float32)

    # Single lane-dense (TM, Ds+Dn) store of the concatenated result in bf16.
    y = jnp.concatenate([ys, yn], axis=-1) + b2_ref[...]
    o_ref[...] = y.astype(o_ref.dtype)


def _run_fused(frames, speech_params, sound_params, tm):
    """frames: (M, hop) f32 with M % tm == 0 -> (M, Ds+Dn) bf16."""
    M, K = frames.shape
    w1s, b1s, w2s, b2s = speech_params
    w1n, b1n, w2n, b2n = sound_params
    Ds = w2s.shape[1]
    Dn = w2n.shape[1]
    Dout = Ds + Dn

    # One-time (tiny) fusion of first-stage weights/biases -> single matmul.
    w1 = jnp.concatenate([w1s, w1n], axis=1)            # (K, Dout) bf16
    b1 = jnp.concatenate([b1s, b1n], axis=1)            # (1, Dout) f32
    b2 = jnp.concatenate([b2s, b2n], axis=1)            # (1, Dout) f32

    row_spec = lambda shape: pl.BlockSpec(shape, lambda i: (i, 0))
    resident = lambda shape: pl.BlockSpec(shape, lambda i: (0, 0))

    params = (w1, b1, w2s, w2n, b2)
    w_bytes = sum(int(p.size) * p.dtype.itemsize for p in params)
    x_tile_bytes = tm * K * frames.dtype.itemsize
    o_tile_bytes = tm * Dout * 2                         # bf16 output
    # double-buffered input+output tiles, resident weights, generous headroom
    vmem_limit = int(max(2 * (x_tile_bytes + o_tile_bytes) + 2 * w_bytes
                         + (8 << 20), 16 << 20))

    flops = 2 * M * K * Dout + 2 * M * (Ds * Ds + Dn * Dn)
    cost = pl.CostEstimate(
        flops=flops,
        transcendentals=M * Dout,
        bytes_accessed=(M * K * frames.dtype.itemsize    # f32 frames in
                        + w_bytes                        # resident params
                        + M * Dout * 2),                 # bf16 features out
    )

    return pl.pallas_call(
        functools.partial(_fused_upstream_kernel, ds=Ds),
        out_shape=jax.ShapeDtypeStruct((M, Dout), jnp.bfloat16),
        grid=(M // tm,),
        in_specs=[
            row_spec((tm, K)),
            resident(w1.shape), resident(b1.shape),
            resident(w2s.shape), resident(w2n.shape),
            resident(b2.shape),
        ],
        out_specs=row_spec((tm, Dout)),
        compiler_params=pltpu.CompilerParams(
            dimension_semantics=("parallel",),
            vmem_limit_bytes=vmem_limit,
        ),
        cost_estimate=cost,
    )(frames, w1, b1, w2s, w2n, b2)


def _choose_tm(M, target):
    """Largest divisor of M that is a multiple of 8 and <= target, preferring
    a grid of >= 2 steps (so both v7x TensorCores get work).  None if no
    usable divisor exists (caller falls back to padding)."""
    if M < 8:
        return None
    cap = min(target, M // 2) if M >= 16 else min(target, M)
    cap -= cap % 8
    for d in range(cap, 7, -8):
        if M % d == 0:
            return d
    upper = min(target, M)
    upper -= upper % 8
    for d in range(upper, 7, -8):
        if M % d == 0:
            return d
    return None


def _init_upstream_params(key, hop, D):
    k1, k2, k3, k4 = jax.random.split(key, 4)
    # Weights in bf16 (MXU-native, half the DMA bytes); biases in f32.
    w1 = (jax.random.normal(k1, (hop, D), jnp.float32) * 0.1).astype(jnp.bfloat16)
    b1 = jax.random.normal(k2, (1, D), jnp.float32) * 0.01
    w2 = (jax.random.normal(k3, (D, D), jnp.float32) * 0.1).astype(jnp.bfloat16)
    b2 = jax.random.normal(k4, (1, D), jnp.float32) * 0.01
    return w1, b1, w2, b2


@functools.partial(jax.jit, static_argnames=("hop", "target_tm"))
def baseline_forward(x, x_len, speech_params, sound_params, *, hop,
                     target_tm=2048):
    """Mirrors Baseline.forward: returns ([concat_feat], speech_feat_len).

    concat_feat is returned in bf16 (f32 accumulation happens in-kernel); cast
    downstream if f32 features are required.
    """
    B, T = x.shape
    num_frames = T // hop
    M = B * num_frames
    frames = x[:, : num_frames * hop].reshape(M, hop)    # stays f32, view-like

    tm = _choose_tm(M, target_tm)
    if tm is not None:
        fused = _run_fused(frames, speech_params, sound_params, tm)
        all_feat = fused.reshape(B, num_frames, -1)
    else:
        # Edge case: M has no usable multiple-of-8 divisor -> pad rows
        # (one extra HBM pass; never hit for typical shapes).
        tm = min(target_tm, max(8, ((M + 7) // 8) * 8))
        Mp = pl.cdiv(M, tm) * tm
        frames_p = jnp.pad(frames, ((0, Mp - M), (0, 0)))
        fused = _run_fused(frames_p, speech_params, sound_params, tm)
        all_feat = fused[:M].reshape(B, num_frames, -1)

    # TODO(synk): x_len // hop is a synthetic stand-in for the real S3PRL
    # feature-length formula of the pretrained upstreams.
    speech_feat_len = (x_len // hop).astype(jnp.int32)
    return [all_feat], speech_feat_len


if __name__ == "__main__":
    # Small deterministic example consistent with the forward signature:
    # x: waveform batch (B, T), x_len: valid lengths per batch element.
    B, T, HOP = 2, 4096, 16
    D_SPEECH, D_SOUND = 128, 128         # lane-aligned feature widths

    key = jax.random.PRNGKey(0)
    kx, ksp, ksn = jax.random.split(key, 3)
    x = jax.random.normal(kx, (B, T), jnp.float32)
    x_len = jnp.array([4096, 3200], dtype=jnp.int32)

    speech_params = _init_upstream_params(ksp, HOP, D_SPEECH)
    sound_params = _init_upstream_params(ksn, HOP, D_SOUND)

    all_feat, all_len = baseline_forward(
        x, x_len, speech_params, sound_params, hop=HOP
    )
    jax.block_until_ready(all_feat[0])
    jax.block_until_ready(all_len)

    F = T // HOP
    assert all_feat[0].shape == (B, F, D_SPEECH + D_SOUND)
    assert all_feat[0].dtype == jnp.bfloat16
    assert all_len.shape == (B,)
    assert bool(jnp.all(all_len == x_len // HOP))

    # Reference check in plain JAX with the same compute dtypes.
    frames_ref = x.reshape(B * F, HOP).astype(jnp.bfloat16)

    def ref_up(params):
        w1, b1, w2, b2 = params
        h = jnp.dot(frames_ref, w1, preferred_element_type=jnp.float32) + b1
        h = jax.nn.gelu(h, approximate=True)
        y = jnp.dot(h.astype(jnp.bfloat16), w2,
                    preferred_element_type=jnp.float32) + b2
        return y.reshape(B, F, -1)

    ref = jnp.concatenate([ref_up(speech_params), ref_up(sound_params)], axis=2)
    got = all_feat[0].astype(jnp.float32)
    # bf16 output => expected error band ~1e-2 relative to the f32 reference.
    assert jnp.allclose(got, ref, atol=3e-2, rtol=3e-2), (
        float(jnp.max(jnp.abs(got - ref))))

    print("KERNEL_OK")
</pallas_src>

<mosaic_0001>
module attributes {stable_mosaic.version = 11 : i64} {
  func.func @_fused_upstream_kernel(%arg0: i32, %arg1: memref<256x16xf32, #tpu.memory_space<vmem>>, %arg2: memref<16x256xbf16, #tpu.memory_space<vmem>>, %arg3: memref<1x256xf32, #tpu.memory_space<vmem>>, %arg4: memref<128x128xbf16, #tpu.memory_space<vmem>>, %arg5: memref<128x128xbf16, #tpu.memory_space<vmem>>, %arg6: memref<1x256xf32, #tpu.memory_space<vmem>>, %arg7: memref<256x256xbf16, #tpu.memory_space<vmem>>) attributes {dimension_semantics = [#tpu.dimension_semantics<parallel>], iteration_bounds = array<i64: 2>, scalar_prefetch = 0 : i64, scratch_operands = 0 : i64, tpu.core_type = #tpu.core_type<tc>, window_params = [{transform_indices = @transform_0, window_bounds = array<i64: 256, 16>}, {pipeline_mode = #tpu.pipeline_mode<synchronous>, transform_indices = @transform_1, window_bounds = array<i64: 16, 256>}, {pipeline_mode = #tpu.pipeline_mode<synchronous>, transform_indices = @transform_2, window_bounds = array<i64: 1, 256>}, {pipeline_mode = #tpu.pipeline_mode<synchronous>, transform_indices = @transform_3, window_bounds = array<i64: 128, 128>}, {pipeline_mode = #tpu.pipeline_mode<synchronous>, transform_indices = @transform_4, window_bounds = array<i64: 128, 128>}, {pipeline_mode = #tpu.pipeline_mode<synchronous>, transform_indices = @transform_5, window_bounds = array<i64: 1, 256>}, {transform_indices = @transform_6, window_bounds = array<i64: 256, 256>}]} {
    %c0 = arith.constant 0 : index
    %c0_0 = arith.constant 0 : index
    %0 = vector.load %arg1[%c0, %c0_0] : memref<256x16xf32, #tpu.memory_space<vmem>>, vector<256x16xf32>
    %1 = arith.truncf %0 : vector<256x16xf32> to vector<256x16xbf16>
    %c0_1 = arith.constant 0 : index
    %c0_2 = arith.constant 0 : index
    %2 = vector.load %arg2[%c0_1, %c0_2] : memref<16x256xbf16, #tpu.memory_space<vmem>>, vector<16x256xbf16>
    %cst = arith.constant dense<0.000000e+00> : vector<256x256xf32>
    %3 = tpu.matmul %1, %2, %cst {dimension_numbers = #tpu.dot_dimension_numbers<[1], [0], [0], [1], [0, 0, 1, 1], [], []>} : vector<256x16xbf16>, vector<16x256xbf16>, vector<256x256xf32> -> vector<256x256xf32>
    %c0_3 = arith.constant 0 : index
    %c0_4 = arith.constant 0 : index
    %4 = vector.load %arg3[%c0_3, %c0_4] : memref<1x256xf32, #tpu.memory_space<vmem>>, vector<1x256xf32>
    %5 = vector.broadcast %4 : vector<1x256xf32> to vector<256x256xf32>
    %6 = arith.addf %3, %5 : vector<256x256xf32>
    %7 = arith.mulf %6, %6 : vector<256x256xf32>
    %8 = arith.mulf %6, %7 : vector<256x256xf32>
    %cst_5 = arith.constant 4.471500e-02 : f32
    %9 = vector.broadcast %cst_5 : f32 to vector<256x256xf32>
    %10 = arith.mulf %9, %8 : vector<256x256xf32>
    %11 = arith.addf %6, %10 : vector<256x256xf32>
    %cst_6 = arith.constant 0.797884583 : f32
    %12 = vector.broadcast %cst_6 : f32 to vector<256x256xf32>
    %13 = arith.mulf %12, %11 : vector<256x256xf32>
    %14 = math.tanh %13 : vector<256x256xf32>
    %cst_7 = arith.constant 1.000000e+00 : f32
    %15 = vector.broadcast %cst_7 : f32 to vector<256x256xf32>
    %16 = arith.addf %15, %14 : vector<256x256xf32>
    %cst_8 = arith.constant 5.000000e-01 : f32
    %17 = vector.broadcast %cst_8 : f32 to vector<256x256xf32>
    %18 = arith.mulf %17, %16 : vector<256x256xf32>
    %19 = arith.mulf %6, %18 : vector<256x256xf32>
    %20 = arith.truncf %19 : vector<256x256xf32> to vector<256x256xbf16>
    %21 = vector.extract_strided_slice %20 {offsets = [0, 0], sizes = [256, 128], strides = [1, 1]} : vector<256x256xbf16> to vector<256x128xbf16>
    %c0_9 = arith.constant 0 : index
    %c0_10 = arith.constant 0 : index
    %22 = vector.load %arg4[%c0_9, %c0_10] : memref<128x128xbf16, #tpu.memory_space<vmem>>, vector<128x128xbf16>
    %cst_11 = arith.constant dense<0.000000e+00> : vector<256x128xf32>
    %23 = tpu.matmul %21, %22, %cst_11 {dimension_numbers = #tpu.dot_dimension_numbers<[1], [0], [0], [1], [0, 0, 1, 1], [], []>} : vector<256x128xbf16>, vector<128x128xbf16>, vector<256x128xf32> -> vector<256x128xf32>
    %24 = vector.extract_strided_slice %20 {offsets = [0, 128], sizes = [256, 128], strides = [1, 1]} : vector<256x256xbf16> to vector<256x128xbf16>
    %c0_12 = arith.constant 0 : index
    %c0_13 = arith.constant 0 : index
    %25 = vector.load %arg5[%c0_12, %c0_13] : memref<128x128xbf16, #tpu.memory_space<vmem>>, vector<128x128xbf16>
    %cst_14 = arith.constant dense<0.000000e+00> : vector<256x128xf32>
    %26 = tpu.matmul %24, %25, %cst_14 {dimension_numbers = #tpu.dot_dimension_numbers<[1], [0], [0], [1], [0, 0, 1, 1], [], []>} : vector<256x128xbf16>, vector<128x128xbf16>, vector<256x128xf32> -> vector<256x128xf32>
    %27 = tpu.concatenate %23, %26 in 1 : vector<256x128xf32>, vector<256x128xf32> -> vector<256x256xf32>
    %c0_15 = arith.constant 0 : index
    %c0_16 = arith.constant 0 : index
    %28 = vector.load %arg6[%c0_15, %c0_16] : memref<1x256xf32, #tpu.memory_space<vmem>>, vector<1x256xf32>
    %29 = vector.broadcast %28 : vector<1x256xf32> to vector<256x256xf32>
    %30 = arith.addf %27, %29 : vector<256x256xf32>
    %31 = arith.truncf %30 : vector<256x256xf32> to vector<256x256xbf16>
    %c0_17 = arith.constant 0 : index
    %c0_18 = arith.constant 0 : index
    %32 = vector.load %arg7[%c0_17, %c0_18] : memref<256x256xbf16, #tpu.memory_space<vmem>>, vector<256x256xbf16>
    tpu.vector_store %arg7[%c0_17, %c0_18], %31 {strides = array<i32>} : memref<256x256xbf16, #tpu.memory_space<vmem>>, vector<256x256xbf16>,
    return
  }
  func.func @transform_0(%arg0: i32) -> (i32, i32) {
    %c0_i32 = arith.constant 0 : i32
    %c0_i32_0 = arith.constant 0 : i32
    return %arg0, %c0_i32 : i32, i32
  }
  func.func @transform_1(%arg0: i32) -> (i32, i32) {
    %c0_i32 = arith.constant 0 : i32
    %c0_i32_0 = arith.constant 0 : i32
    %c0_i32_1 = arith.constant 0 : i32
    return %c0_i32, %c0_i32_0 : i32, i32
  }
  func.func @transform_2(%arg0: i32) -> (i32, i32) {
    %c0_i32 = arith.constant 0 : i32
    %c0_i32_0 = arith.constant 0 : i32
    %c0_i32_1 = arith.constant 0 : i32
    return %c0_i32, %c0_i32_0 : i32, i32
  }
  func.func @transform_3(%arg0: i32) -> (i32, i32) {
    %c0_i32 = arith.constant 0 : i32
    %c0_i32_0 = arith.constant 0 : i32
    %c0_i32_1 = arith.constant 0 : i32
    return %c0_i32, %c0_i32_0 : i32, i32
  }
  func.func @transform_4(%arg0: i32) -> (i32, i32) {
    %c0_i32 = arith.constant 0 : i32
    %c0_i32_0 = arith.constant 0 : i32
    %c0_i32_1 = arith.constant 0 : i32
    return %c0_i32, %c0_i32_0 : i32, i32
  }
  func.func @transform_5(%arg0: i32) -> (i32, i32) {
    %c0_i32 = arith.constant 0 : i32
    %c0_i32_0 = arith.constant 0 : i32
    %c0_i32_1 = arith.constant 0 : i32
    return %c0_i32, %c0_i32_0 : i32, i32
  }
  func.func @transform_6(%arg0: i32) -> (i32, i32) {
    %c0_i32 = arith.constant 0 : i32
    %c0_i32_0 = arith.constant 0 : i32
    return %arg0, %c0_i32 : i32, i32
  }
}

</mosaic_0001>

<bundles_post_ra>
// kernel: baseline_forward.1
= control target key start
LH: loop header
LB: loop body
LE: loop exit
PB: predicated region body
PF: predicated region fallthrough
CT: control target
= control target key end

     0   :  { %11 = vsyncpa [#allocation3], 0  ;;  %s3714_s0 = inlined_call_operand.vmem [shape: f32[512,16], index: 0, kind: input, shape index: {}]   ;;  %s3715_s1 = inlined_call_operand.vmem [shape: bf16[16,256], index: 1, kind: input, shape index: {}]   ;;  %s3716_s2 = inlined_call_operand.vmem [shape: f32[1,256], index: 2, kind: input, shape index: {}]   ;;  %s3717_s3 = inlined_call_operand.vmem [shape: bf16[128,128], index: 3, kind: input, shape index: {}]   ;;  %s3718_s4 = inlined_call_operand.vmem [shape: bf16[128,128], index: 4, kind: input, shape index: {}]   ;;  %s3719_s5 = inlined_call_operand.vmem [shape: f32[1,256], index: 5, kind: input, shape index: {}]   ;;  %s3720_s6 = inlined_call_operand.hbm [shape: bf16[512,256], index: 6, kind: output, shape index: {}]  }
   0x1   :  { %13 = vsyncpa [#allocation3 + $0x1], 0  ;;  %s2568_s21 = smov 0   ;;  %s2570_s22 = smov 0  }
   0x2   :  { %s2572_s23 = smov 0   ;;  %s2574_s24 = smov 0  }
   0x3 LB: > { %s2589_s25 = sadd.s32 4294967295, %s2527_s24   ;;  %s2003_s26 = sadd.s32 4294967294, %s2527_s24   ;;  %s2527_s24 = sphi %s2574_s24, %s3809_s24   ;;  %s2523_s23 = sphi %s2572_s23, %s3808_s23   ;;  %s2519_s22 = sphi %s2570_s22, %s3807_s22   ;;  %s2515_s21 = sphi %s2568_s21, %s3806_s21  }
   0x4   : > { %s2593_s27 = sadd.s32 1, %s2527_s24   ;;  %s157_s28 = sadd.s32 1, %s2523_s23 }
   0x5   : > { %s154_s29 = ssub.s32 %s2527_s24, %s2593_s27  ;;  %p167_p0 = scmp.ne.s32.totalorder %s2523_s23, %s2519_s22 }
   0x6   : > { %p155_p1 = scmp.eq.s32.totalorder %s154_s29, 0  ;;  %p168_p2 = scmp.eq.s32.totalorder %s2589_s25, 1 }
   0x7   : > { %p173_p3 = scmp.ne.s32.totalorder %s2519_s22, %s2515_s21  ;;  %p174_p4 = scmp.eq.s32.totalorder %s2003_s26, 1 }
   0x8   : > { %s2604_s30 = scalar_select %p155_p1, %s2523_s23, %s157_s28  }
   0x9   : > { %p2606_p5 = por %p168_p2, %p167_p0  ;;  %p2610_p6 = por %p174_p4, %p173_p3 }
   0xa   : > { %p2006_p7 = scmp.ge.s32.totalorder %s2527_s24, 1  ;;  %p216_p8 = scmp.lt.s32.totalorder %s2527_s24, 3 }
   0xc   : > { %p217_p9 = pnand %p2006_p7, %p216_p8 }
   0xe   : > { %220 = sbr.rel (%p217_p9) target bundleno = 704 (0x2c0), region = 44 }
  0x15   : > { %v2318_v0 = vld [vmem:[%s3715_s1 + $0x4] ss:$8 sps:$4 sm:$0xff]   ;;  %s2008_s11 = sshll.u32 %s2589_s25, 5  ;;  %v2320_v1 = vld [vmem:[%s3715_s1] ss:$8 sps:$4 sm:$0xff]   ;;  %v2529_v2 = vmov 0   ;;  %v306_v59 = vlaneseq }
  0x16   : > { %407 = vmatprep.mubr.bf16.mxu0 %v2529_v2  ;;  %p247_p10 = scmp.lt.s32.totalorder %s2008_s11, 63  ;;  %375 = vmatprep.subr.bf16.mxu0 %v2318_v0  ;;  %vm326_vm0 = vcmask 130048   ;;  %v2321_v41 = vld [vmem:[%s3717_s3] sm:$0xff]   ;;  %v2322_v43 = vld [vmem:[%s3717_s3 + $0x8] sm:$0xff]   ;;  %v2323_v46 = vld [vmem:[%s3717_s3 + $0x10] sm:$0xff]   ;;  %s243_s9 = sand.u32 1, %s2519_s22  }
  0x17   : > { %376 = vmatpush1.bf16.msra.mxu0 %v2320_v1  ;;  %2260 = vmatprep.subr.bf16.mxu1 %v2321_v41  ;;  %v2324_v48 = vld [vmem:[%s3717_s3 + $0x18] sm:$0xff]   ;;  %v2325_v51 = vld [vmem:[%s3717_s3 + $0x20] sm:$0xff]   ;;  %v2326_v53 = vld [vmem:[%s3717_s3 + $0x28] sm:$0xff]   ;;  %v2716_v60 = vshrl.u32 %v306_v59, 7  ;;  %s2007_s10 = sshll.u32 %s243_s9, 8  ;;  %s2115_s12 = sshll.u32 %s2589_s25, 12 }
  0x18   : > { %s3811_s11 = smov (!%p247_p10, %s2008_s11), 63  ;;  %2164 = vmatprep.subr.bf16.mxu0 %v2321_v41  ;;  %2268 = vmatpush3.bf16.msra.mxu1 %v2321_v41  ;;  %v2327_v57 = vld [vmem:[%s3717_s3 + $0x30] sm:$0xff]   ;;  %v2328_v58 = vld [vmem:[%s3717_s3 + $0x38] sm:$0xff]   ;;  %v304_v62 = vld [vmem:[%s3716_s2] sm:$0x3]  ;;  %s3664_s15 = scalar_lea.hbm %s3720_s6, %s2115_s12 }
  0x19   : > { %s2009_s14 = sshll.u32 %s3811_s11, 3  ;;  %2261 = vmatprep.subr.bf16.mxu1 %v2322_v43  ;;  %3745 = vst [vmem:[#allocation5_spill] sm:$0xff] %v2716_v60  ;;  %v3722_v61 = vsub.s32 0, %v2716_v60  ;;  %v3721_v63 = vsub.s32 1, %v2716_v60  ;;  %v2730_v1 = vld [vmem:[%s3718_s4] sm:$0xff]   ;;  %s3548_s11 = scalar_lea.vmem [#allocation2], %s2007_s10 }
  0x1a   : > { %s2627_s17 = scalar_lea.vmem %s3714_s0, %s2009_s14  ;;  %s1941_s13 = sshll.u32 %s3548_s11, 4  ;;  %s3666_s13 = int_to_ptr.vmem [resolvable:$true] %s1941_s13 }
  0x1b   : > { %v254_v3 = vld [vmem:[%s2627_s17] sm:$0xff]  ;;  %v255_v4 = vld [vmem:[%s2627_s17 + $0x8] sm:$0xff]  ;;  %v256_v6 = vld [vmem:[%s2627_s17 + $0x10] sm:$0xff]  ;;  %v2725_v0 = vrot.slane %v304_v62, %v3722_v61  ;;  %s3673_s16 = scalar_lea.sflag [#allocation3], %s243_s9  ;;  %s2465_s18 = scalar_lea.vmem %s3666_s13, 4096 }
  0x1c   : > { %v286_v5 = vpack.c.bf16 %v255_v4, %v254_v3  ;;  %v257_v7 = vld [vmem:[%s2627_s17 + $0x18] sm:$0xff]  ;;  %v258_v9 = vld [vmem:[%s2627_s17 + $0x20] sm:$0xff]  ;;  %v259_v10 = vld [vmem:[%s2627_s17 + $0x28] sm:$0xff]  ;;  %2269 = vmatpush3.bf16.msra.mxu1 %v2322_v43  ;;  %p2466_p11 = scmp.ne.s32.totalorder %s3666_s13, %s2465_s18  ;;  %s2530_s19 = smov [#allocation2]  }
  0x1d   : > { %v287_v8 = vpack.c.bf16 %v257_v7, %v256_v6  ;;  %v288_v11 = vpack.c.bf16 %v259_v10, %v258_v9  ;;  %v260_v12 = vld [vmem:[%s2627_s17 + $0x30] sm:$0xff]  ;;  %v261_v13 = vld [vmem:[%s2627_s17 + $0x38] sm:$0xff]  ;;  %v262_v15 = vld [vmem:[%s2627_s17 + $0x40] sm:$0xff]  ;;  %2262 = vmatprep.subr.bf16.mxu1 %v2323_v46 }
  0x1e   : > { %2012 = vmatmul.mubr.msk.bf16.vlgmr.msra.gmra.mrb[0].mxu0 %vm326_vm0, %v286_v5  ;;  %v289_v14 = vpack.c.bf16 %v261_v13, %v260_v12  ;;  %v263_v16 = vld [vmem:[%s2627_s17 + $0x48] sm:$0xff]  ;;  %v264_v18 = vld [vmem:[%s2627_s17 + $0x50] sm:$0xff]  ;;  %v265_v19 = vld [vmem:[%s2627_s17 + $0x58] sm:$0xff]  ;;  %p2467_p12 = pnand %p2466_p11, %p2606_p5 }
  0x1f   : > { %417 = vmatprep.mubr.bf16.mxu0 %v2529_v2  ;;  %v290_v17 = vpack.c.bf16 %v263_v16, %v262_v15  ;;  %v291_v20 = vpack.c.bf16 %v265_v19, %v264_v18  ;;  %v266_v21 = vld [vmem:[%s2627_s17 + $0x60] sm:$0xff]  ;;  %v267_v22 = vld [vmem:[%s2627_s17 + $0x68] sm:$0xff]  ;;  %v268_v24 = vld [vmem:[%s2627_s17 + $0x70] sm:$0xff]  ;;  %2165 = vmatpush3.bf16.msra.mxu0 %v2321_v41 }
  0x20   : > { %v292_v23 = vpack.c.bf16 %v267_v22, %v266_v21  ;;  %v269_v25 = vld [vmem:[%s2627_s17 + $0x78] sm:$0xff]  ;;  %v270_v27 = vld [vmem:[%s2627_s17 + $0x80] sm:$0xff]  ;;  %v271_v28 = vld [vmem:[%s2627_s17 + $0x88] sm:$0xff]  ;;  %2166 = vmatprep.subr.bf16.mxu0 %v2322_v43  ;;  %2270 = vmatpush3.bf16.msra.mxu1 %v2323_v46  ;;  %p2468_p13 = pneg %p2467_p12 }
  0x21   : > { %v293_v26 = vpack.c.bf16 %v269_v25, %v268_v24  ;;  %v294_v29 = vpack.c.bf16 %v271_v28, %v270_v27  ;;  %v272_v30 = vld [vmem:[%s2627_s17 + $0x90] sm:$0xff]  ;;  %v273_v31 = vld [vmem:[%s2627_s17 + $0x98] sm:$0xff]  ;;  %v274_v33 = vld [vmem:[%s2627_s17 + $0xa0] sm:$0xff]  ;;  %2263 = vmatprep.subr.bf16.mxu1 %v2324_v48 }
  0x22   : > { %v295_v32 = vpack.c.bf16 %v273_v31, %v272_v30  ;;  %v275_v34 = vld [vmem:[%s2627_s17 + $0xa8] sm:$0xff]  ;;  %v276_v36 = vld [vmem:[%s2627_s17 + $0xb0] sm:$0xff]  ;;  %v277_v37 = vld [vmem:[%s2627_s17 + $0xb8] sm:$0xff] }
  0x23   : > { %v296_v35 = vpack.c.bf16 %v275_v34, %v274_v33  ;;  %v297_v38 = vpack.c.bf16 %v277_v37, %v276_v36  ;;  %v278_v39 = vld [vmem:[%s2627_s17 + $0xc0] sm:$0xff]  ;;  %v279_v40 = vld [vmem:[%s2627_s17 + $0xc8] sm:$0xff]  ;;  %v280_v44 = vld [vmem:[%s2627_s17 + $0xd0] sm:$0xff]  ;;  %2167 = vmatpush3.bf16.msra.mxu0 %v2322_v43 }
  0x24   : > { %v298_v42 = vpack.c.bf16 %v279_v40, %v278_v39  ;;  %v281_v45 = vld [vmem:[%s2627_s17 + $0xd8] sm:$0xff]  ;;  %2168 = vmatprep.subr.bf16.mxu0 %v2323_v46  ;;  %v282_v49 = vld [vmem:[%s2627_s17 + $0xe0] sm:$0xff]  ;;  %v283_v50 = vld [vmem:[%s2627_s17 + $0xe8] sm:$0xff]  ;;  %2271 = vmatpush3.bf16.msra.mxu1 %v2324_v48 }
  0x25   : > { %v299_v47 = vpack.c.bf16 %v281_v45, %v280_v44  ;;  %v300_v52 = vpack.c.bf16 %v283_v50, %v282_v49  ;;  %2264 = vmatprep.subr.bf16.mxu1 %v2325_v51  ;;  %v284_v54 = vld [vmem:[%s2627_s17 + $0xf0] sm:$0xff]  ;;  %v285_v55 = vld [vmem:[%s2627_s17 + $0xf8] sm:$0xff]  ;;  %s2469_s17 = sshll.u32 %s2530_s19, 4  ;;  %s2470_s17 = int_to_ptr.vmem [resolvable:$false] %s2469_s17 }
  0x26   : > { %2013 = vmatmul.mubr.msk.bf16.gmra.mrb[4].mxu0 %vm326_vm0, %v287_v8  ;;  %v301_v56 = vpack.c.bf16 %v285_v55, %v284_v54  ;;  %s2471_s20 = scalar_lea.vmem %s2470_s17, 8192  ;;  %p2472_p0 = scmp.lt.s32.totalorder %s3666_s13, %s2470_s17 }
  0x27   : > { %427 = vmatprep.mubr.bf16.mxu0 %v2529_v2  ;;  %2169 = vmatpush3.bf16.msra.mxu0 %v2323_v46  ;;  %p2473_p1 = scmp.lt.s32.totalorder %s2471_s20, %s2465_s18 }
  0x28   : > { %2170 = vmatprep.subr.bf16.mxu0 %v2324_v48  ;;  %2272 = vmatpush3.bf16.msra.mxu1 %v2325_v51 }
  0x29   : > { %2265 = vmatprep.subr.bf16.mxu1 %v2326_v53  ;;  %p2474_p2 = por %p2473_p1, %p2472_p0 }
  0x2b   : > { %2171 = vmatpush3.bf16.msra.mxu0 %v2324_v48  ;;  %p2475_p3 = pnand %p2474_p2, %p2468_p13 }
  0x2c   : > { %2172 = vmatprep.subr.bf16.mxu0 %v2325_v51  ;;  %2273 = vmatpush3.bf16.msra.mxu1 %v2326_v53 }
  0x2d   : > { %2266 = vmatprep.subr.bf16.mxu1 %v2327_v57 }
  0x2e   : > { %2014 = vmatmul.mubr.msk.bf16.gmra.mrb[8].mxu0 %vm326_vm0, %v288_v11 }
  0x2f   : > { %437 = vmatprep.mubr.bf16.mxu0 %v2529_v2  ;;  %2173 = vmatpush3.bf16.msra.mxu0 %v2325_v51 }
  0x30   : > { %2174 = vmatprep.subr.bf16.mxu0 %v2326_v53  ;;  %2274 = vmatpush3.bf16.msra.mxu1 %v2327_v57 }
  0x31   : > { %2267 = vmatprep.subr.bf16.mxu1 %v2328_v58 }
  0x33   : > { %2175 = vmatpush3.bf16.msra.mxu0 %v2326_v53 }
  0x34   : > { %2176 = vmatprep.subr.bf16.mxu0 %v2327_v57  ;;  %2275 = vmatpush3.bf16.msra.mxu1 %v2328_v58 }
  0x35   : > { %2212 = vmatprep.subr.bf16.mxu1 %v2730_v1 }
  0x36   : > { %2015 = vmatmul.mubr.msk.bf16.gmra.mrb[12].mxu0 %vm326_vm0, %v289_v14 }
  0x37   : > { %447 = vmatprep.mubr.bf16.mxu0 %v2529_v2  ;;  %2177 = vmatpush3.bf16.msra.mxu0 %v2327_v57 }
  0x38   : > { %2178 = vmatprep.subr.bf16.mxu0 %v2328_v58 }
  0x3b   : > { %2179 = vmatpush3.bf16.msra.mxu0 %v2328_v58 }
  0x3e   : > { %2016 = vmatmul.mubr.msk.bf16.gmra.mrb[16].mxu0 %vm326_vm0, %v290_v17 }
  0x3f   : > { %457 = vmatprep.mubr.bf16.mxu0 %v2529_v2 }
  0x46   : > { %2017 = vmatmul.mubr.msk.bf16.gmra.mrb[20].mxu0 %vm326_vm0, %v291_v20 }
  0x47   : > { %467 = vmatprep.mubr.bf16.mxu0 %v2529_v2 }
  0x4e   : > { %2018 = vmatmul.mubr.msk.bf16.gmra.mrb[24].mxu0 %vm326_vm0, %v292_v23 }
  0x4f   : > { %477 = vmatprep.mubr.bf16.mxu0 %v2529_v2 }
  0x56   : > { %2019 = vmatmul.mubr.msk.bf16.gmra.mrb[28].mxu0 %vm326_vm0, %v293_v26 }
  0x57   : > { %487 = vmatprep.mubr.bf16.mxu0 %v2529_v2 }
  0x5e   : > { %2020 = vmatmul.mubr.msk.bf16.gmra.mrb[32].mxu0 %vm326_vm0, %v294_v29 }
  0x5f   : > { %497 = vmatprep.mubr.bf16.mxu0 %v2529_v2 }
  0x66   : > { %2021 = vmatmul.mubr.msk.bf16.gmra.mrb[36].mxu0 %vm326_vm0, %v295_v32 }
  0x67   : > { %507 = vmatprep.mubr.bf16.mxu0 %v2529_v2 }
  0x6e   : > { %2022 = vmatmul.mubr.msk.bf16.gmra.mrb[40].mxu0 %vm326_vm0, %v296_v35 }
  0x6f   : > { %517 = vmatprep.mubr.bf16.mxu0 %v2529_v2 }
  0x76   : > { %2023 = vmatmul.mubr.msk.bf16.gmra.mrb[44].mxu0 %vm326_vm0, %v297_v38 }
  0x77   : > { %527 = vmatprep.mubr.bf16.mxu0 %v2529_v2 }
  0x7e   : > { %2024 = vmatmul.mubr.msk.bf16.gmra.mrb[48].mxu0 %vm326_vm0, %v298_v42 }
  0x7f   : > { %537 = vmatprep.mubr.bf16.mxu0 %v2529_v2 }
  0x86   : > { %2025 = vmatmul.mubr.msk.bf16.gmra.mrb[52].mxu0 %vm326_vm0, %v299_v47 }
  0x87   : > { %547 = vmatprep.mubr.bf16.mxu0 %v2529_v2 }
  0x8e   : > { %2026 = vmatmul.mubr.msk.bf16.gmra.mrb[56].mxu0 %vm326_vm0, %v300_v52 }
  0x8f   : > { %557 = vmatprep.mubr.bf16.mxu0 %v2529_v2  ;;  %v2734_v2 = vrot.slane %v304_v62, %v3721_v63 }
  0x96   : > { %2027 = vmatmul.mubr.msk.bf16.gmra.mrb[60].mxu0 %vm326_vm0, %v301_v56 }
  0xf1   : > { %v409_v3 = vpop.f32.mrb[0].mxu0 }
  0xf2   : > { %v2738_v4 = vadd.f32 %v409_v3, %v2725_v0  ;;  %v411_v5 = vpop.f32.mrb[1].mxu0 }
  0xf3   : > { %v2741_v6 = vadd.f32 %v411_v5, %v2734_v2  ;;  %v413_v7 = vpop.f32.mrb[2].mxu0 }
  0xf4   : > { %v568_v8 = vmul.f32 %v2738_v4, %v2738_v4  ;;  %v2746_v9 = vadd.f32 %v413_v7, %v2725_v0  ;;  %v415_v10 = vpop.f32.mrb[3].mxu0 }
  0xf5   : > { %v569_v11 = vmul.f32 %v2741_v6, %v2741_v6  ;;  %v2751_v12 = vadd.f32 %v415_v10, %v2734_v2 }
  0xf6   : > { %v632_v13 = vmul.f32 %v568_v8, %v2738_v4  ;;  %v570_v14 = vmul.f32 %v2746_v9, %v2746_v9 }
  0xf7   : > { %v633_v15 = vmul.f32 %v569_v11, %v2741_v6  ;;  %v571_v16 = vmul.f32 %v2751_v12, %v2751_v12 }
  0xf8   : > { %v696_v17 = vmul.f32 0.044715, %v632_v13  ;;  %v634_v18 = vmul.f32 %v570_v14, %v2746_v9 }
  0xf9   : > { %v697_v19 = vmul.f32 0.044715, %v633_v15  ;;  %v635_v20 = vmul.f32 %v571_v16, %v2751_v12  ;;  %v419_v21 = vpop.f32.mrb[4].mxu0 }
  0xfa   : > { %v760_v22 = vadd.f32 %v696_v17, %v2738_v4  ;;  %v698_v23 = vmul.f32 0.044715, %v634_v18  ;;  %v2763_v24 = vadd.f32 %v419_v21, %v2725_v0  ;;  %v421_v25 = vpop.f32.mrb[5].mxu0 }
  0xfb   : > { %v761_v26 = vadd.f32 %v697_v19, %v2741_v6  ;;  %v699_v27 = vmul.f32 0.044715, %v635_v20  ;;  %v2767_v28 = vadd.f32 %v421_v25, %v2734_v2  ;;  %v423_v29 = vpop.f32.mrb[6].mxu0 }
  0xfc   : > { %v824_v30 = vmul.f32 0.7978846, %v760_v22  ;;  %v762_v31 = vadd.f32 %v698_v23, %v2746_v9  ;;  %v572_v32 = vmul.f32 %v2763_v24, %v2763_v24  ;;  %v2773_v33 = vadd.f32 %v423_v29, %v2725_v0  ;;  %v425_v34 = vpop.f32.mrb[7].mxu0 }
  0xfd   : > { %v825_v35 = vmul.f32 0.7978846, %v761_v26  ;;  %v763_v36 = vadd.f32 %v699_v27, %v2751_v12  ;;  %v573_v37 = vmul.f32 %v2767_v28, %v2767_v28  ;;  %v2779_v38 = vadd.f32 %v425_v34, %v2734_v2 }
  0xfe   : > { %2337 = vtanh.f32 %v824_v30  ;;  %v826_v39 = vmul.f32 0.7978846, %v762_v31  ;;  %v636_v40 = vmul.f32 %v572_v32, %v2763_v24  ;;  %v574_v41 = vmul.f32 %v2773_v33, %v2773_v33 }
  0xff   : > { %2339 = vtanh.f32 %v825_v35  ;;  %v827_v42 = vmul.f32 0.7978846, %v763_v36  ;;  %v637_v43 = vmul.f32 %v573_v37, %v2767_v28  ;;  %v575_v44 = vmul.f32 %v2779_v38, %v2779_v38 }
 0x100   : > { %2341 = vtanh.f32 %v826_v39  ;;  %v700_v45 = vmul.f32 0.044715, %v636_v40  ;;  %v638_v46 = vmul.f32 %v574_v41, %v2773_v33 }
 0x101   : > { %v701_v47 = vmul.f32 0.044715, %v637_v43  ;;  %v639_v48 = vmul.f32 %v575_v44, %v2779_v38  ;;  %v429_v49 = vpop.f32.mrb[8].mxu0  ;;  %2343 = vtanh.f32 %v827_v42 }
 0x102   : > { %v764_v50 = vadd.f32 %v700_v45, %v2763_v24  ;;  %v702_v51 = vmul.f32 0.044715, %v638_v46  ;;  %v2791_v52 = vadd.f32 %v429_v49, %v2725_v0  ;;  %v431_v53 = vpop.f32.mrb[9].mxu0 }
 0x103   : > { %v765_v54 = vadd.f32 %v701_v47, %v2767_v28  ;;  %v703_v55 = vmul.f32 0.044715, %v639_v48  ;;  %v2795_v56 = vadd.f32 %v431_v53, %v2734_v2  ;;  %v433_v57 = vpop.f32.mrb[10].mxu0 }
 0x104   : > { %v828_v58 = vmul.f32 0.7978846, %v764_v50  ;;  %v766_v59 = vadd.f32 %v702_v51, %v2773_v33  ;;  %v576_v62 = vmul.f32 %v2791_v52, %v2791_v52  ;;  %v2801_v3 = vadd.f32 %v433_v57, %v2725_v0  ;;  %v435_v5 = vpop.f32.mrb[11].mxu0 }
 0x105   : > { %v829_v7 = vmul.f32 0.7978846, %v765_v54  ;;  %v767_v8 = vadd.f32 %v703_v55, %v2779_v38  ;;  %v577_v10 = vmul.f32 %v2795_v56, %v2795_v56  ;;  %v2807_v11 = vadd.f32 %v435_v5, %v2734_v2 }
 0x106   : > { %2345 = vtanh.f32 %v828_v58  ;;  %v830_v13 = vmul.f32 0.7978846, %v766_v59  ;;  %v640_v14 = vmul.f32 %v576_v62, %v2791_v52  ;;  %v578_v15 = vmul.f32 %v2801_v3, %v2801_v3 }
 0x107   : > { %2347 = vtanh.f32 %v829_v7  ;;  %v831_v16 = vmul.f32 0.7978846, %v767_v8  ;;  %v641_v17 = vmul.f32 %v577_v10, %v2795_v56  ;;  %v579_v18 = vmul.f32 %v2807_v11, %v2807_v11 }
 0x108   : > { %v2338_v19 = vpop.eup %2337  ;;  %2349 = vtanh.f32 %v830_v13  ;;  %v704_v20 = vmul.f32 0.044715, %v640_v14  ;;  %v642_v21 = vmul.f32 %v578_v15, %v2801_v3 }
 0x109   : > { %v2340_v22 = vpop.eup %2339  ;;  %2351 = vtanh.f32 %v831_v16  ;;  %v705_v23 = vmul.f32 0.044715, %v641_v17  ;;  %v643_v25 = vmul.f32 %v579_v18, %v2807_v11  ;;  %v439_v26 = vpop.f32.mrb[12].mxu0  ;;  %v952_v27 = vadd.f32 1.0, %v2338_v19 }
 0x10a   : > { %v2342_v29 = vpop.eup %2341  ;;  %v706_v30 = vmul.f32 0.044715, %v642_v21  ;;  %v2818_v31 = vadd.f32 %v439_v26, %v2725_v0  ;;  %v441_v32 = vpop.f32.mrb[13].mxu0  ;;  %v768_v34 = vadd.f32 %v704_v20, %v2791_v52  ;;  %v2821_v35 = vadd.f32 1.0, %v2340_v22 }
 0x10b   : > { %v769_v36 = vadd.f32 %v705_v23, %v2795_v56  ;;  %v707_v37 = vmul.f32 0.044715, %v643_v25  ;;  %v2825_v39 = vadd.f32 %v441_v32, %v2734_v2  ;;  %v443_v40 = vpop.f32.mrb[14].mxu0  ;;  %v954_v41 = vadd.f32 1.0, %v2342_v29  ;;  %v2835_v47 = vpop.eup %2343 }
 0x10c   : > { %v580_v42 = vmul.f32 %v2818_v31, %v2818_v31  ;;  %v2830_v43 = vadd.f32 %v443_v40, %v2725_v0  ;;  %v445_v44 = vpop.f32.mrb[15].mxu0  ;;  %v1016_v45 = vmul.f32 0.5, %v952_v27  ;;  %v2833_v46 = vadd.f32 %v706_v30, %v2801_v3 }
 0x10d   : > { %v833_v48 = vmul.f32 0.7978846, %v769_v36  ;;  %v771_v49 = vadd.f32 %v707_v37, %v2807_v11  ;;  %v581_v50 = vmul.f32 %v2825_v39, %v2825_v39  ;;  %v2841_v51 = vadd.f32 %v445_v44, %v2734_v2 }
 0x10e   : > { %v644_v53 = vmul.f32 %v580_v42, %v2818_v31  ;;  %v582_v54 = vmul.f32 %v2830_v43, %v2830_v43  ;;  %v1018_v55 = vmul.f32 0.5, %v954_v41  ;;  %v1080_v57 = vmul.f32 %v1016_v45, %v2738_v4 }
 0x10f   : > { %2353 = vtanh.f32 %v833_v48  ;;  %v835_v58 = vmul.f32 0.7978846, %v771_v49  ;;  %v645_v59 = vmul.f32 %v581_v50, %v2825_v39  ;;  %v583_v62 = vmul.f32 %v2841_v51, %v2841_v51 }
 0x110   : > { %v2346_v5 = vpop.eup %2345  ;;  %v708_v7 = vmul.f32 0.044715, %v644_v53  ;;  %v646_v8 = vmul.f32 %v582_v54, %v2830_v43  ;;  %v1082_v10 = vmul.f32 %v1018_v55, %v2746_v9  ;;  %v2852_v13 = vmul.f32 0.7978846, %v768_v34 }
 0x111   : > { %v2348_v14 = vpop.eup %2347  ;;  %v956_v15 = vadd.f32 1.0, %v2346_v5  ;;  %2355 = vtanh.f32 %v835_v58  ;;  %v709_v16 = vmul.f32 0.044715, %v645_v59  ;;  %v647_v4 = vmul.f32 %v583_v62, %v2841_v51  ;;  %v449_v17 = vpop.f32.mrb[16].mxu0 }
 0x112   : > { %v2350_v18 = vpop.eup %2349  ;;  %v957_v19 = vadd.f32 1.0, %v2348_v14  ;;  %v772_v20 = vadd.f32 %v708_v7, %v2818_v31  ;;  %v710_v21 = vmul.f32 0.044715, %v646_v8  ;;  %v2857_v22 = vadd.f32 %v449_v17, %v2725_v0  ;;  %v451_v23 = vpop.f32.mrb[17].mxu0 }
 0x113   : > { %v2352_v25 = vpop.eup %2351  ;;  %v1020_v9 = vmul.f32 0.5, %v956_v15  ;;  %v958_v26 = vadd.f32 1.0, %v2350_v18  ;;  %v773_v27 = vadd.f32 %v709_v16, %v2825_v39  ;;  %v711_v29 = vmul.f32 0.044715, %v647_v4  ;;  %v453_v30 = vpop.f32.mrb[18].mxu0 }
 0x114   : > { %v1021_v32 = vmul.f32 0.5, %v957_v19  ;;  %v959_v34 = vadd.f32 1.0, %v2352_v25  ;;  %v836_v36 = vmul.f32 0.7978846, %v772_v20  ;;  %v774_v37 = vadd.f32 %v710_v21, %v2830_v43  ;;  %v455_v40 = vpop.f32.mrb[19].mxu0 }
 0x115   : > { %v1084_v41 = vmul.f32 %v1020_v9, %v2763_v24  ;;  %v1022_v42 = vmul.f32 0.5, %v958_v26  ;;  %v837_v44 = vmul.f32 0.7978846, %v773_v27  ;;  %v775_v45 = vadd.f32 %v711_v29, %v2841_v51 }
 0x116   : > { %v2864_v48 = vmul.f32 %v1021_v32, %v2767_v28  ;;  %v1023_v49 = vmul.f32 0.5, %v959_v34  ;;  %2357 = vtanh.f32 %v836_v36  ;;  %v838_v50 = vmul.f32 0.7978846, %v774_v37 }
 0x117   : > { %v1086_v53 = vmul.f32 %v1022_v42, %v2773_v33  ;;  %2359 = vtanh.f32 %v837_v44  ;;  %v839_v54 = vmul.f32 0.7978846, %v775_v45  ;;  %v584_v55 = vmul.f32 %v2857_v22, %v2857_v22 }
 0x118   : > { %3746 = vst [vmem:[#allocation6_spill] sm:$0xff] %v2864_v48  ;;  %v2870_v58 = vmul.f32 %v1023_v49, %v2779_v38  ;;  %2361 = vtanh.f32 %v838_v50  ;;  %v2873_v24 = vadd.f32 %v451_v23, %v2734_v2  ;;  %v2876_v28 = vadd.f32 %v453_v30, %v2725_v0 }
 0x119   : > { %v2878_v59 = vpop.eup %2353  ;;  %v1146_v62 = vpack.c.bf16 %v1086_v53, %v1084_v41  ;;  %2363 = vtanh.f32 %v839_v54  ;;  %v648_v33 = vmul.f32 %v584_v55, %v2857_v22  ;;  %v1144_v5 = vpack.c.bf16 %v1082_v10, %v1080_v57  ;;  %v459_v7 = vpop.f32.mrb[20].mxu0 }
 0x11a   : > { %3747 = vst [vmem:[#allocation7_spill] sm:$0xff] %v2870_v58  ;;  %v585_v38 = vmul.f32 %v2873_v24, %v2873_v24  ;;  %v586_v14 = vmul.f32 %v2876_v28, %v2876_v28  ;;  %v2888_v15 = vadd.f32 %v455_v40, %v2734_v2  ;;  %v461_v16 = vpop.f32.mrb[21].mxu0  ;;  %v2893_v57 = vadd.f32 %v459_v7, %v2725_v0 }
 0x11b   : > { %v2890_v4 = vpop.eup %2355  ;;  %v712_v17 = vmul.f32 0.044715, %v648_v33  ;;  %2180 = vmatprep.mubr.bf16.mxu0 %v1144_v5  ;;  %v2896_v10 = vadd.f32 %v461_v16, %v2734_v2  ;;  %v463_v18 = vpop.f32.mrb[22].mxu0  ;;  %v2899_v19 = vmul.f32 0.7978846, %v2833_v46 }
 0x11c   : > { %v649_v20 = vmul.f32 %v585_v38, %v2873_v24  ;;  %v650_v21 = vmul.f32 %v586_v14, %v2876_v28  ;;  %v587_v23 = vmul.f32 %v2888_v15, %v2888_v15  ;;  %v2906_v25 = vadd.f32 %v463_v18, %v2725_v0  ;;  %2181 = vmatmul.mubr.bf16.vlgmr.msra.gmra.mrb[64].mxu0 %v1146_v62  ;;  %v465_v9 = vpop.f32.mrb[23].mxu0 }
 0x11d   : > { %v776_v26 = vadd.f32 %v712_v17, %v2857_v22  ;;  %v588_v27 = vmul.f32 %v2893_v57, %v2893_v57  ;;  %v589_v46 = vmul.f32 %v2896_v10, %v2896_v10  ;;  %v2914_v29 = vadd.f32 %v465_v9, %v2734_v2 }
 0x11e   : > { %v713_v30 = vmul.f32 0.044715, %v649_v20  ;;  %v714_v32 = vmul.f32 0.044715, %v650_v21  ;;  %v651_v34 = vmul.f32 %v587_v23, %v2888_v15  ;;  %v590_v36 = vmul.f32 %v2906_v25, %v2906_v25 }
 0x11f   : > { %3748 = vst [vmem:[#allocation8_spill] sm:$0xff] %v2914_v29  ;;  %v840_v37 = vmul.f32 0.7978846, %v776_v26  ;;  %v652_v40 = vmul.f32 %v588_v27, %v2893_v57  ;;  %v653_v41 = vmul.f32 %v589_v46, %v2896_v10  ;;  %v591_v42 = vmul.f32 %v2914_v29, %v2914_v29 }
 0x120   : > { %v2358_v44 = vpop.eup %2357  ;;  %v777_v45 = vadd.f32 %v713_v30, %v2873_v24  ;;  %v778_v49 = vadd.f32 %v714_v32, %v2876_v28  ;;  %v715_v50 = vmul.f32 0.044715, %v651_v34  ;;  %v654_v53 = vmul.f32 %v590_v36, %v2906_v25 }
 0x121   : > { %v2926_v54 = vpop.eup %2359  ;;  %2365 = vtanh.f32 %v840_v37  ;;  %v716_v55 = vmul.f32 0.044715, %v652_v40  ;;  %v717_v62 = vmul.f32 0.044715, %v653_v41  ;;  %v655_v33 = vmul.f32 %v591_v42, %v2914_v29  ;;  %v469_v5 = vpop.f32.mrb[24].mxu0 }
 0x122   : > { %v2362_v7 = vpop.eup %2361  ;;  %v841_v38 = vmul.f32 0.7978846, %v777_v45  ;;  %v842_v14 = vmul.f32 0.7978846, %v778_v49  ;;  %v779_v16 = vadd.f32 %v715_v50, %v2888_v15  ;;  %v718_v17 = vmul.f32 0.044715, %v654_v53 }
 0x123   : > { %v2930_v18 = vpop.eup %2363  ;;  %v780_v20 = vadd.f32 %v716_v55, %v2893_v57  ;;  %v781_v21 = vadd.f32 %v717_v62, %v2896_v10  ;;  %v719_v23 = vmul.f32 0.044715, %v655_v33  ;;  %v2935_v9 = vadd.f32 %v469_v5, %v2725_v0  ;;  %v471_v26 = vpop.f32.mrb[25].mxu0 }
 0x124   : > { %2367 = vtanh.f32 %v841_v38  ;;  %v843_v27 = vmul.f32 0.7978846, %v779_v16  ;;  %v782_v46 = vadd.f32 %v718_v17, %v2906_v25  ;;  %v2939_v30 = vadd.f32 %v471_v26, %v2734_v2  ;;  %v473_v32 = vpop.f32.mrb[26].mxu0 }
 0x125   : > { %2369 = vtanh.f32 %v842_v14  ;;  %v844_v34 = vmul.f32 0.7978846, %v780_v20  ;;  %v845_v36 = vmul.f32 0.7978846, %v781_v21  ;;  %v783_v37 = vadd.f32 %v719_v23, %v2914_v29  ;;  %v475_v40 = vpop.f32.mrb[27].mxu0 }
 0x126   : > { %3749 = vst [vmem:[#allocation9_spill] sm:$0xff] %v2939_v30  ;;  %2371 = vtanh.f32 %v843_v27  ;;  %v846_v41 = vmul.f32 0.7978846, %v782_v46  ;;  %v592_v42 = vmul.f32 %v2935_v9, %v2935_v9  ;;  %v593_v45 = vmul.f32 %v2939_v30, %v2939_v30 }
 0x127   : > { %2373 = vtanh.f32 %v844_v34  ;;  %v847_v49 = vmul.f32 0.7978846, %v783_v37  ;;  %v2947_v50 = vadd.f32 %v473_v32, %v2725_v0  ;;  %v2950_v53 = vadd.f32 %v475_v40, %v2734_v2 }
 0x128   : > { %2375 = vtanh.f32 %v845_v36  ;;  %v656_v55 = vmul.f32 %v592_v42, %v2935_v9  ;;  %v657_v62 = vmul.f32 %v593_v45, %v2939_v30  ;;  %v964_v33 = vadd.f32 1.0, %v2358_v44 }
 0x129   : > { %3750 = vst [vmem:[#allocation10_spill] sm:$0xff] %v2950_v53  ;;  %2377 = vtanh.f32 %v846_v41  ;;  %v594_v5 = vmul.f32 %v2947_v50, %v2947_v50  ;;  %v595_v38 = vmul.f32 %v2950_v53, %v2950_v53  ;;  %v479_v14 = vpop.f32.mrb[28].mxu0  ;;  %v966_v16 = vadd.f32 1.0, %v2362_v7 }
 0x12a   : > { %2379 = vtanh.f32 %v847_v49  ;;  %v720_v17 = vmul.f32 0.044715, %v656_v55  ;;  %v721_v20 = vmul.f32 0.044715, %v657_v62  ;;  %v2959_v21 = vadd.f32 %v479_v14, %v2725_v0  ;;  %v481_v23 = vpop.f32.mrb[29].mxu0 }
 0x12b   : > { %v2366_v26 = vpop.eup %2365  ;;  %v658_v27 = vmul.f32 %v594_v5, %v2947_v50  ;;  %2381 = vtanh.f32 %v2852_v13  ;;  %v659_v44 = vmul.f32 %v595_v38, %v2950_v53  ;;  %v2965_v46 = vadd.f32 %v481_v23, %v2734_v2  ;;  %v483_v32 = vpop.f32.mrb[30].mxu0 }
 0x12c   : > { %v784_v7 = vadd.f32 %v720_v17, %v2935_v9  ;;  %v785_v34 = vadd.f32 %v721_v20, %v2939_v30  ;;  %2383 = vtanh.f32 %v2899_v19  ;;  %v596_v36 = vmul.f32 %v2959_v21, %v2959_v21  ;;  %v485_v37 = vpop.f32.mrb[31].mxu0 }
 0x12d   : > { %3751 = vst [vmem:[#allocation11_spill] sm:$0xff] %v2965_v46  ;;  %v722_v40 = vmul.f32 0.044715, %v658_v27  ;;  %v723_v41 = vmul.f32 0.044715, %v659_v44  ;;  %v597_v13 = vmul.f32 %v2965_v46, %v2965_v46  ;;  %v2975_v42 = vadd.f32 %v483_v32, %v2725_v0 }
 0x12e   : > { %v2977_v45 = vpop.eup %2367  ;;  %v848_v49 = vmul.f32 0.7978846, %v784_v7  ;;  %v849_v55 = vmul.f32 0.7978846, %v785_v34  ;;  %v660_v62 = vmul.f32 %v596_v36, %v2959_v21  ;;  %v1028_v5 = vmul.f32 0.5, %v964_v33 }
 0x12f   : > { %v2370_v19 = vpop.eup %2369  ;;  %v786_v38 = vadd.f32 %v722_v40, %v2947_v50  ;;  %v787_v14 = vadd.f32 %v723_v41, %v2950_v53  ;;  %v661_v17 = vmul.f32 %v597_v13, %v2965_v46  ;;  %v598_v20 = vmul.f32 %v2975_v42, %v2975_v42 }
 0x130   : > { %v2985_v23 = vpop.eup %2371  ;;  %2385 = vtanh.f32 %v848_v49  ;;  %v724_v27 = vmul.f32 0.044715, %v660_v62  ;;  %v1030_v44 = vmul.f32 0.5, %v966_v16  ;;  %v2988_v32 = vmul.f32 %v1028_v5, %v2818_v31 }
 0x131   : > { %v2990_v7 = vpop.eup %2373  ;;  %2387 = vtanh.f32 %v849_v55  ;;  %v850_v33 = vmul.f32 0.7978846, %v786_v38  ;;  %v851_v34 = vmul.f32 0.7978846, %v787_v14  ;;  %v725_v36 = vmul.f32 0.044715, %v661_v17 }
 0x132   : > { %v2992_v40 = vpop.eup %2375  ;;  %v788_v41 = vadd.f32 %v724_v27, %v2959_v21  ;;  %v662_v13 = vmul.f32 %v598_v20, %v2975_v42  ;;  %v2997_v63 = vmul.f32 %v1030_v44, %v2830_v43  ;;  %v3000_v16 = vadd.f32 %v485_v37, %v2734_v2  ;;  %v489_v31 = vpop.f32.mrb[32].mxu0 }
 0x133   : > { %v3002_v49 = vpop.eup %2377  ;;  %2389 = vtanh.f32 %v850_v33  ;;  %v789_v55 = vadd.f32 %v725_v36, %v2965_v46  ;;  %v3006_v62 = vadd.f32 %v489_v31, %v2725_v0  ;;  %v491_v5 = vpop.f32.mrb[33].mxu0  ;;  %v968_v38 = vadd.f32 1.0, %v2366_v26 }
 0x134   : > { %3752 = vst [vmem:[#allocation12_spill] sm:$0xff] %v3000_v16  ;;  %v3008_v14 = vpop.eup %2379  ;;  %2391 = vtanh.f32 %v851_v34  ;;  %v852_v17 = vmul.f32 0.7978846, %v788_v41  ;;  %v726_v43 = vmul.f32 0.044715, %v662_v13  ;;  %v1150_v37 = vpack.c.bf16 %v2997_v63, %v2988_v32  ;;  %v493_v20 = vpop.f32.mrb[34].mxu0 }
 0x135   : > { %v2382_v27 = vpop.eup %2381  ;;  %v853_v44 = vmul.f32 0.7978846, %v789_v55  ;;  %v599_v33 = vmul.f32 %v3000_v16, %v3000_v16  ;;  %v600_v36 = vmul.f32 %v3006_v62, %v3006_v62  ;;  %v3017_v31 = vadd.f32 %v491_v5, %v2734_v2  ;;  %v495_v26 = vpop.f32.mrb[35].mxu0 }
 0x136   : > { %v2384_v61 = vpop.eup %2383  ;;  %v960_v34 = vadd.f32 1.0, %v2382_v27  ;;  %2393 = vtanh.f32 %v852_v17  ;;  %v790_v41 = vadd.f32 %v726_v43, %v2975_v42  ;;  %v3021_v63 = vadd.f32 %v493_v20, %v2725_v0 }
 0x137   : > { %3753 = vst [vmem:[#allocation13_spill] sm:$0xff] %v3017_v31  ;;  %v962_v32 = vadd.f32 1.0, %v2384_v61  ;;  %2395 = vtanh.f32 %v853_v44  ;;  %v663_v13 = vmul.f32 %v599_v33, %v3000_v16  ;;  %v664_v55 = vmul.f32 %v600_v36, %v3006_v62 }
 0x138   : > { %v1024_v8 = vmul.f32 0.5, %v960_v34  ;;  %v854_v60 = vmul.f32 0.7978846, %v790_v41  ;;  %v601_v5 = vmul.f32 %v3017_v31, %v3017_v31  ;;  %v602_v27 = vmul.f32 %v3021_v63, %v3021_v63 }
 0x139   : > { %v1026_v17 = vmul.f32 0.5, %v962_v32  ;;  %v727_v48 = vmul.f32 0.044715, %v663_v13  ;;  %v728_v43 = vmul.f32 0.044715, %v664_v55  ;;  %v970_v58 = vadd.f32 1.0, %v2370_v19 }
 0x13a   : > { %v3029_v20 = vpop.eup %2385  ;;  %v1088_v61 = vmul.f32 %v1024_v8, %v2791_v52  ;;  %2397 = vtanh.f32 %v854_v60  ;;  %v665_v44 = vmul.f32 %v601_v5, %v3017_v31  ;;  %v666_v33 = vmul.f32 %v602_v27, %v3021_v63  ;;  %v499_v36 = vpop.f32.mrb[36].mxu0 }
 0x13b   : > { %v3034_v34 = vpop.eup %2387  ;;  %v1090_v41 = vmul.f32 %v1026_v17, %v2801_v3  ;;  %v791_v46 = vadd.f32 %v727_v48, %v3000_v16  ;;  %v792_v32 = vadd.f32 %v728_v43, %v3006_v62  ;;  %v1032_v13 = vmul.f32 0.5, %v968_v38  ;;  %v501_v19 = vpop.f32.mrb[37].mxu0 }
 0x13c   : > { %v729_v55 = vmul.f32 0.044715, %v665_v44  ;;  %v730_v53 = vmul.f32 0.044715, %v666_v33  ;;  %v1034_v30 = vmul.f32 0.5, %v970_v58  ;;  %v3040_v60 = vadd.f32 %v495_v26, %v2734_v2  ;;  %v503_v52 = vpop.f32.mrb[38].mxu0 }
 0x13d   : > { %v3042_v8 = vpop.eup %2389  ;;  %v1148_v5 = vpack.c.bf16 %v1090_v41, %v1088_v61  ;;  %v855_v27 = vmul.f32 0.7978846, %v791_v46  ;;  %v856_v29 = vmul.f32 0.7978846, %v792_v32  ;;  %v1096_v3 = vmul.f32 %v1032_v13, %v2857_v22  ;;  %v505_v17 = vpop.f32.mrb[39].mxu0  ;;  %v2330_v61 = vld [vmem:[%s3718_s4 + $0x8] sm:$0xff]  }
 0x13e   : > { %3754 = vst [vmem:[#allocation14_spill] sm:$0xff] %v3040_v60  ;;  %v3045_v48 = vpop.eup %2391  ;;  %v793_v38 = vadd.f32 %v729_v55, %v3017_v31  ;;  %v794_v43 = vadd.f32 %v730_v53, %v3021_v63  ;;  %v1098_v58 = vmul.f32 %v1034_v30, %v2876_v28  ;;  %v603_v26 = vmul.f32 %v3040_v60, %v3040_v60 }
 0x13f   : > { %2184 = vmatprep.mubr.bf16.mxu1 %v1148_v5  ;;  %2399 = vtanh.f32 %v855_v27  ;;  %v3056_v22 = vadd.f32 %v499_v36, %v2725_v0  ;;  %v3059_v46 = vadd.f32 %v501_v19, %v2734_v2  ;;  %v3062_v44 = vadd.f32 %v503_v52, %v2725_v0  ;;  %v2331_v27 = vld [vmem:[%s3718_s4 + $0x10] sm:$0xff]  }
 0x140   : > { %v3064_v53 = vpop.eup %2393  ;;  %2185 = vmatmul.mubr.bf16.vlgmr.msra.gmra.mrb[0].mxu1 %v1150_v37  ;;  %2401 = vtanh.f32 %v856_v29  ;;  %v857_v28 = vmul.f32 0.7978846, %v793_v38  ;;  %v858_v30 = vmul.f32 0.7978846, %v794_v43  ;;  %v1152_v33 = vpack.c.bf16 %v1098_v58, %v1096_v3 }
 0x141   : > { %3755 = vst [vmem:[#allocation15_spill] sm:$0xff] %v3059_v46  ;;  %v3066_v41 = vpop.eup %2395  ;;  %v667_v32 = vmul.f32 %v603_v26, %v3040_v60  ;;  %v604_v36 = vmul.f32 %v3056_v22, %v3056_v22  ;;  %v605_v13 = vmul.f32 %v3059_v46, %v3059_v46  ;;  %v606_v19 = vmul.f32 %v3062_v44, %v3062_v44  ;;  %v509_v55 = vpop.f32.mrb[40].mxu0 }
 0x142   : > { %2213 = vmatpush3.bf16.msra.mxu1 %v2730_v1  ;;  %2403 = vtanh.f32 %v857_v28  ;;  %2188 = vmatprep.mubr.bf16.mxu1 %v1152_v33  ;;  %v972_v29 = vadd.f32 1.0, %v2990_v7  ;;  %v974_v37 = vadd.f32 1.0, %v3002_v49  ;;  %v3079_v52 = vadd.f32 %v505_v17, %v2734_v2  ;;  %v511_v5 = vpop.f32.mrb[41].mxu0 }
 0x143   : > { %2214 = vmatprep.subr.bf16.mxu1 %v2330_v61  ;;  %2405 = vtanh.f32 %v858_v30  ;;  %v731_v3 = vmul.f32 0.044715, %v667_v32  ;;  %v668_v38 = vmul.f32 %v604_v36, %v3056_v22  ;;  %v669_v1 = vmul.f32 %v605_v13, %v3059_v46  ;;  %v513_v43 = vpop.f32.mrb[42].mxu0 }
 0x144   : > { %3756 = vst [vmem:[#allocation16_spill] sm:$0xff] %v3079_v52  ;;  %v3086_v58 = vpop.eup %2397  ;;  %v670_v7 = vmul.f32 %v606_v19, %v3062_v44  ;;  %v1036_v49 = vmul.f32 0.5, %v972_v29  ;;  %v1038_v17 = vmul.f32 0.5, %v974_v37  ;;  %v607_v26 = vmul.f32 %v3079_v52, %v3079_v52  ;;  %v515_v28 = vpop.f32.mrb[43].mxu0  ;;  %v2332_v29 = vld [vmem:[%s3718_s4 + $0x18] sm:$0xff]  }
 0x145   : > { %v795_v33 = vadd.f32 %v731_v3, %v3040_v60  ;;  %v732_v31 = vmul.f32 0.044715, %v668_v38  ;;  %v733_v30 = vmul.f32 0.044715, %v669_v1  ;;  %v3093_v32 = vadd.f32 %v509_v55, %v2725_v0 }
 0x146   : > { %2215 = vmatpush3.bf16.msra.mxu1 %v2330_v61  ;;  %v734_v36 = vmul.f32 0.044715, %v670_v7  ;;  %v1100_v13 = vmul.f32 %v1036_v49, %v2893_v57  ;;  %v1102_v16 = vmul.f32 %v1038_v17, %v2906_v25  ;;  %v671_v19 = vmul.f32 %v607_v26, %v3079_v52 }
 0x147   : > { %2216 = vmatprep.subr.bf16.mxu1 %v2331_v27  ;;  %v859_v37 = vmul.f32 0.7978846, %v795_v33  ;;  %v796_v3 = vadd.f32 %v732_v31, %v3056_v22  ;;  %v797_v38 = vadd.f32 %v733_v30, %v3059_v46  ;;  %v608_v61 = vmul.f32 %v3093_v32, %v3093_v32 }
 0x148   : > { %v798_v55 = vadd.f32 %v734_v36, %v3062_v44  ;;  %v1154_v57 = vpack.c.bf16 %v1102_v16, %v1100_v13  ;;  %v735_v1 = vmul.f32 0.044715, %v671_v19  ;;  %v3107_v25 = vadd.f32 %v511_v5, %v2734_v2  ;;  %v2333_v19 = vld [vmem:[%s3718_s4 + $0x20] sm:$0xff]  }
 0x149   : > { %v3109_v7 = vpop.eup %2399  ;;  %2407 = vtanh.f32 %v859_v37  ;;  %v860_v49 = vmul.f32 0.7978846, %v796_v3  ;;  %v861_v17 = vmul.f32 0.7978846, %v797_v38  ;;  %v672_v26 = vmul.f32 %v608_v61, %v3093_v32  ;;  %v519_v31 = vpop.f32.mrb[44].mxu0 }
 0x14a   : > { %3757 = vst [vmem:[#allocation17_spill] sm:$0xff] %v3107_v25  ;;  %3758 = vst [vmem:[#allocation18_spill] sm:$0xff] %v3109_v7  ;;  %2217 = vmatpush3.bf16.msra.mxu1 %v2331_v27  ;;  %v3112_v33 = vpop.eup %2401  ;;  %v862_v30 = vmul.f32 0.7978846, %v798_v55  ;;  %v799_v36 = vadd.f32 %v735_v1, %v3079_v52  ;;  %v609_v16 = vmul.f32 %v3107_v25, %v3107_v25  ;;  %v521_v13 = vpop.f32.mrb[45].mxu0  ;;  %v976_v37 = vadd.f32 1.0, %v3029_v20 }
 0x14b   : > { %2189 = vmatmul.mubr.bf16.gmra.mrb[4].mxu1 %v1154_v57  ;;  %v3118_v5 = vadd.f32 %v513_v43, %v2725_v0  ;;  %2218 = vmatprep.subr.bf16.mxu1 %v2332_v29  ;;  %2409 = vtanh.f32 %v860_v49  ;;  %v736_v27 = vmul.f32 0.044715, %v672_v26  ;;  %v978_v3 = vadd.f32 1.0, %v3042_v8  ;;  %v523_v38 = vpop.f32.mrb[46].mxu0 }
 0x14c   : > { %v3125_v61 = vpop.eup %2403  ;;  %2411 = vtanh.f32 %v861_v17  ;;  %v863_v55 = vmul.f32 0.7978846, %v799_v36  ;;  %v673_v43 = vmul.f32 %v609_v16, %v3107_v25  ;;  %v525_v1 = vpop.f32.mrb[47].mxu0  ;;  %v1040_v26 = vmul.f32 0.5, %v976_v37  ;;  %v2334_v36 = vld [vmem:[%s3718_s4 + $0x28] sm:$0xff]  }
 0x14d   : > { %3759 = vst [vmem:[#allocation19_spill] sm:$0xff] %v3125_v61  ;;  %v610_v57 = vmul.f32 %v3118_v5, %v3118_v5  ;;  %v3130_v52 = vpop.eup %2405  ;;  %2413 = vtanh.f32 %v862_v30  ;;  %v800_v49 = vadd.f32 %v736_v27, %v3093_v32  ;;  %v1042_v20 = vmul.f32 0.5, %v978_v3 }
 0x14e   : > { %2219 = vmatpush3.bf16.msra.mxu1 %v2332_v29  ;;  %2415 = vtanh.f32 %v863_v55  ;;  %v737_v8 = vmul.f32 0.044715, %v673_v43  ;;  %v3135_v17 = vadd.f32 %v515_v28, %v2734_v2  ;;  %v1104_v30 = vmul.f32 %v1040_v26, %v2935_v9 }
 0x14f   : > { %v674_v46 = vmul.f32 %v610_v57, %v3118_v5  ;;  %2220 = vmatprep.subr.bf16.mxu1 %v2333_v19  ;;  %v864_v16 = vmul.f32 0.7978846, %v800_v49  ;;  %v1106_v27 = vmul.f32 %v1042_v20, %v2947_v50  ;;  %v3143_v37 = vadd.f32 %v519_v31, %v2725_v0  ;;  %v2335_v20 = vld [vmem:[%s3718_s4 + $0x30] sm:$0xff]  }
 0x150   : > { %3760 = vst [vmem:[#allocation20_spill] sm:$0xff] %v3135_v17  ;;  %v801_v29 = vadd.f32 %v737_v8, %v3107_v25  ;;  %v611_v28 = vmul.f32 %v3135_v17, %v3135_v17  ;;  %v3149_v55 = vadd.f32 %v521_v13, %v2734_v2  ;;  %v3154_v9 = vadd.f32 %v523_v38, %v2725_v0 }
 0x151   : > { %v738_v3 = vmul.f32 0.044715, %v674_v46  ;;  %2417 = vtanh.f32 %v864_v16  ;;  %v1156_v43 = vpack.c.bf16 %v1106_v27, %v1104_v30  ;;  %v612_v57 = vmul.f32 %v3143_v37, %v3143_v37  ;;  %v529_v50 = vpop.f32.mrb[48].mxu0 }
 0x152   : > { %3761 = vst [vmem:[#allocation21_spill] sm:$0xff] %v3149_v55  ;;  %2221 = vmatpush3.bf16.msra.mxu1 %v2333_v19  ;;  %v865_v31 = vmul.f32 0.7978846, %v801_v29  ;;  %v675_v46 = vmul.f32 %v611_v28, %v3135_v17  ;;  %v613_v26 = vmul.f32 %v3149_v55, %v3149_v55  ;;  %v531_v13 = vpop.f32.mrb[49].mxu0  ;;  %v614_v19 = vmul.f32 %v3154_v9, %v3154_v9 }
 0x153   : > { %v802_v49 = vadd.f32 %v738_v3, %v3118_v5  ;;  %2222 = vmatprep.subr.bf16.mxu1 %v2334_v36  ;;  %v3163_v8 = vpop.eup %2407  ;;  %2192 = vmatprep.mubr.bf16.mxu1 %v1156_v43  ;;  %v676_v38 = vmul.f32 %v612_v57, %v3143_v37  ;;  %v980_v16 = vadd.f32 1.0, %v3064_v53  ;;  %v982_v30 = vadd.f32 1.0, %v3086_v58  ;;  %v533_v27 = vpop.f32.mrb[50].mxu0 }
 0x154   : > { %3762 = vst [vmem:[#allocation22_spill] sm:$0xff] %v3163_v8  ;;  %2419 = vtanh.f32 %v865_v31  ;;  %v739_v3 = vmul.f32 0.044715, %v675_v46  ;;  %v677_v28 = vmul.f32 %v613_v26, %v3149_v55  ;;  %v535_v25 = vpop.f32.mrb[51].mxu0  ;;  %v678_v43 = vmul.f32 %v614_v19, %v3154_v9 }
 0x155   : > { %v866_v29 = vmul.f32 0.7978846, %v802_v49  ;;  %v3171_v60 = vpop.eup %2409  ;;  %v740_v8 = vmul.f32 0.044715, %v676_v38  ;;  %v1044_v57 = vmul.f32 0.5, %v980_v16  ;;  %v1046_v61 = vmul.f32 0.5, %v982_v30 }
 0x156   : > { %2223 = vmatpush3.bf16.msra.mxu1 %v2334_v36  ;;  %v3174_v7 = vpop.eup %2411  ;;  %v803_v53 = vadd.f32 %v739_v3, %v3135_v17  ;;  %v741_v58 = vmul.f32 0.044715, %v677_v28  ;;  %v3178_v31 = vadd.f32 %v525_v1, %v2734_v2  ;;  %v2336_v49 = vld [vmem:[%s3718_s4 + $0x38] sm:$0xff]   ;;  %v742_v38 = vmul.f32 0.044715, %v678_v43 }
 0x157   : > { %3763 = vst [vmem:[#allocation23_spill] sm:$0xff] %v3174_v7  ;;  %2421 = vtanh.f32 %v866_v29  ;;  %2224 = vmatprep.subr.bf16.mxu1 %v2335_v20  ;;  %v3183_v46 = vpop.eup %2413  ;;  %v804_v26 = vadd.f32 %v740_v8, %v3143_v37  ;;  %v1108_v36 = vmul.f32 %v1044_v57, %v2959_v21  ;;  %v1110_v19 = vmul.f32 %v1046_v61, %v2975_v42 }
 0x158   : > { %3764 = vst [vmem:[#allocation24_spill] sm:$0xff] %v3178_v31  ;;  %v3188_v16 = vpop.eup %2415  ;;  %v867_v30 = vmul.f32 0.7978846, %v803_v53  ;;  %v805_v1 = vadd.f32 %v741_v58, %v3149_v55  ;;  %v615_v29 = vmul.f32 %v3178_v31, %v3178_v31  ;;  %v3194_v3 = vadd.f32 %v529_v50, %v2725_v0 }
 0x159   : > { %3765 = vst [vmem:[#allocation25_spill] sm:$0xff] %v3188_v16  ;;  %v868_v28 = vmul.f32 0.7978846, %v804_v26  ;;  %v806_v17 = vadd.f32 %v742_v38, %v3154_v9  ;;  %v1158_v8 = vpack.c.bf16 %v1110_v19, %v1108_v36  ;;  %v3198_v43 = vadd.f32 %v531_v13, %v2734_v2  ;;  %v539_v21 = vpop.f32.mrb[52].mxu0 }
 0x15a   : > { %2225 = vmatpush3.bf16.msra.mxu1 %v2335_v20  ;;  %2423 = vtanh.f32 %v867_v30  ;;  %v869_v42 = vmul.f32 0.7978846, %v805_v1  ;;  %v679_v61 = vmul.f32 %v615_v29, %v3178_v31  ;;  %v616_v57 = vmul.f32 %v3194_v3, %v3194_v3  ;;  %v541_v53 = vpop.f32.mrb[53].mxu0 }
 0x15b   : > { %3766 = vst [vmem:[#allocation26_spill] sm:$0xff] %v3198_v43  ;;  %2226 = vmatprep.subr.bf16.mxu1 %v2336_v49  ;;  %v3203_v50 = vpop.eup %2417  ;;  %2425 = vtanh.f32 %v868_v28  ;;  %v870_v58 = vmul.f32 0.7978846, %v806_v17  ;;  %2193 = vmatmul.mubr.bf16.gmra.mrb[8].mxu1 %v1158_v8  ;;  %v617_v13 = vmul.f32 %v3198_v43, %v3198_v43  ;;  %v3208_v26 = vadd.f32 %v533_v27, %v2725_v0  ;;  %v543_v20 = vpop.f32.mrb[54].mxu0 }
 0x15c   : > { %2427 = vtanh.f32 %v869_v42  ;;  %v743_v38 = vmul.f32 0.044715, %v679_v61  ;;  %v680_v36 = vmul.f32 %v616_v57, %v3194_v3  ;;  %v984_v19 = vadd.f32 1.0, %v3112_v33  ;;  %v545_v30 = vpop.f32.mrb[55].mxu0 }
 0x15d   : > { %2429 = vtanh.f32 %v870_v58  ;;  %v681_v1 = vmul.f32 %v617_v13, %v3198_v43  ;;  %v618_v17 = vmul.f32 %v3208_v26, %v3208_v26  ;;  %v986_v29 = vadd.f32 1.0, %v3130_v52 }
 0x15e   : > { %2227 = vmatpush3.bf16.msra.mxu1 %v2336_v49  ;;  %v3216_v28 = vpop.eup %2419  ;;  %v807_v27 = vadd.f32 %v743_v38, %v3178_v31  ;;  %v744_v8 = vmul.f32 0.044715, %v680_v36  ;;  %v1048_v42 = vmul.f32 0.5, %v984_v19  ;;  %v3220_v61 = vadd.f32 %v535_v25, %v2734_v2 }
 0x15f   : > { %3767 = vst [vmem:[#allocation27_spill] sm:$0xff] %v3216_v28  ;;  %v745_v33 = vmul.f32 0.044715, %v681_v1  ;;  %v682_v57 = vmul.f32 %v618_v17, %v3208_v26  ;;  %v1050_v58 = vmul.f32 0.5, %v986_v29  ;;  %v3224_v13 = vadd.f32 %v539_v21, %v2725_v0 }
 0x160   : > { %3768 = vst [vmem:[#allocation28_spill] sm:$0xff] %v3220_v61  ;;  %v871_v52 = vmul.f32 0.7978846, %v807_v27  ;;  %v808_v49 = vadd.f32 %v744_v8, %v3194_v3  ;;  %v1112_v28 = vmul.f32 %v1048_v42, %v3006_v62  ;;  %v619_v38 = vmul.f32 %v3220_v61, %v3220_v61 }
 0x161   : > { %v3226_v55 = vpop.eup %2421  ;;  %v809_v25 = vadd.f32 %v745_v33, %v3198_v43  ;;  %v746_v36 = vmul.f32 0.044715, %v682_v57  ;;  %v1114_v19 = vmul.f32 %v1050_v58, %v3021_v63  ;;  %v620_v1 = vmul.f32 %v3224_v13, %v3224_v13  ;;  %v549_v21 = vpop.f32.mrb[56].mxu0 }
 0x162   : > { %2431 = vtanh.f32 %v871_v52  ;;  %v872_v17 = vmul.f32 0.7978846, %v808_v49  ;;  %v683_v29 = vmul.f32 %v619_v38, %v3220_v61  ;;  %v3238_v27 = vadd.f32 %v541_v53, %v2734_v2  ;;  %v551_v62 = vpop.f32.mrb[57].mxu0 }
 0x163   : > { %v873_v8 = vmul.f32 0.7978846, %v809_v25  ;;  %v810_v42 = vadd.f32 %v746_v36, %v3208_v26  ;;  %v1160_v31 = vpack.c.bf16 %v1114_v19, %v1112_v28  ;;  %v684_v33 = vmul.f32 %v620_v1, %v3224_v13  ;;  %v553_v57 = vpop.f32.mrb[58].mxu0 }
 0x164   : > { %3769 = vst [vmem:[#allocation29_spill] sm:$0xff] %v3238_v27  ;;  %v3242_v63 = vpop.eup %2423  ;;  %2433 = vtanh.f32 %v872_v17  ;;  %v747_v58 = vmul.f32 0.044715, %v683_v29  ;;  %v621_v52 = vmul.f32 %v3238_v27, %v3238_v27  ;;  %v3247_v49 = vadd.f32 %v543_v20, %v2725_v0  ;;  %v555_v53 = vpop.f32.mrb[59].mxu0 }
 0x165   : > { %3770 = vst [vmem:[#allocation30_spill] sm:$0xff] %v3242_v63  ;;  %v3249_v38 = vpop.eup %2425  ;;  %2435 = vtanh.f32 %v873_v8  ;;  %v874_v25 = vmul.f32 0.7978846, %v810_v42  ;;  %2196 = vmatprep.mubr.bf16.mxu1 %v1160_v31  ;;  %v748_v28 = vmul.f32 0.044715, %v684_v33  ;;  %v988_v36 = vadd.f32 1.0, %v3171_v60 }
 0x166   : > { %v3252_v19 = vpop.eup %2427  ;;  %v811_v1 = vadd.f32 %v747_v58, %v3220_v61  ;;  %v685_v17 = vmul.f32 %v621_v52, %v3238_v27  ;;  %v622_v29 = vmul.f32 %v3247_v49, %v3247_v49  ;;  %v990_v20 = vadd.f32 1.0, %v3183_v46 }
 0x167   : > { %3771 = vst [vmem:[#allocation31_spill] sm:$0xff] %v3252_v19  ;;  %v3259_v43 = vpop.eup %2429  ;;  %2437 = vtanh.f32 %v874_v25  ;;  %v812_v8 = vadd.f32 %v748_v28, %v3224_v13  ;;  %v1052_v31 = vmul.f32 0.5, %v988_v36  ;;  %v3263_v42 = vadd.f32 %v545_v30, %v2734_v2 }
 0x168   : > { %v875_v60 = vmul.f32 0.7978846, %v811_v1  ;;  %v749_v33 = vmul.f32 0.044715, %v685_v17  ;;  %v686_v58 = vmul.f32 %v622_v29, %v3247_v49  ;;  %v1054_v61 = vmul.f32 0.5, %v990_v20 }
 0x169   : > { %v876_v52 = vmul.f32 0.7978846, %v812_v8  ;;  %v1116_v19 = vmul.f32 %v1052_v31, %v3056_v22  ;;  %v623_v46 = vmul.f32 %v3263_v42, %v3263_v42  ;;  %v3270_v63 = vadd.f32 %v549_v21, %v2725_v0  ;;  %v559_v25 = vpop.f32.mrb[60].mxu0 }
 0x16a   : > { %2439 = vtanh.f32 %v875_v60  ;;  %v813_v28 = vadd.f32 %v749_v33, %v3238_v27  ;;  %v750_v30 = vmul.f32 0.044715, %v686_v58  ;;  %v1118_v36 = vmul.f32 %v1054_v61, %v3062_v44  ;;  %v561_v1 = vpop.f32.mrb[61].mxu0 }
 0x16b   : > { %2441 = vtanh.f32 %v876_v52  ;;  %v687_v17 = vmul.f32 %v623_v46, %v3263_v42  ;;  %v624_v22 = vmul.f32 %v3270_v63, %v3270_v63  ;;  %v3278_v29 = vadd.f32 %v551_v62, %v2734_v2  ;;  %v563_v20 = vpop.f32.mrb[62].mxu0 }
 0x16c   : > { %v3280_v21 = vpop.eup %2431  ;;  %v877_v8 = vmul.f32 0.7978846, %v813_v28  ;;  %v814_v31 = vadd.f32 %v750_v30, %v3247_v49  ;;  %v1162_v60 = vpack.c.bf16 %v1118_v36, %v1116_v19  ;;  %v3284_v33 = vadd.f32 %v553_v57, %v2725_v0  ;;  %v565_v44 = vpop.f32.mrb[63].mxu0 }
 0x16d   : > { %3772 = vst [vmem:[#allocation32_spill] sm:$0xff] %v3280_v21  ;;  %v751_v61 = vmul.f32 0.044715, %v687_v17  ;;  %v688_v58 = vmul.f32 %v624_v22, %v3270_v63  ;;  %v625_v52 = vmul.f32 %v3278_v29, %v3278_v29  ;;  %v992_v62 = vadd.f32 1.0, %v3203_v50 }
 0x16e   : > { %v2434_v46 = vpop.eup %2433  ;;  %2443 = vtanh.f32 %v877_v8  ;;  %v878_v27 = vmul.f32 0.7978846, %v814_v31  ;;  %2197 = vmatmul.mubr.bf16.gmra.mrb[12].mxu1 %v1162_v60  ;;  %v626_v28 = vmul.f32 %v3284_v33, %v3284_v33  ;;  %v994_v19 = vadd.f32 1.0, %v3226_v55 }
 0x16f   : > { %v3293_v57 = vpop.eup %2435  ;;  %v815_v30 = vadd.f32 %v751_v61, %v3263_v42  ;;  %v752_v36 = vmul.f32 0.044715, %v688_v58  ;;  %v689_v17 = vmul.f32 %v625_v52, %v3278_v29  ;;  %v1056_v22 = vmul.f32 0.5, %v992_v62 }
 0x170   : > { %3773 = vst [vmem:[#allocation33_spill] sm:$0xff] %v3293_v57  ;;  %2445 = vtanh.f32 %v878_v27  ;;  %v690_v50 = vmul.f32 %v626_v28, %v3284_v33  ;;  %v1058_v21 = vmul.f32 0.5, %v994_v19  ;;  %v3299_v8 = vadd.f32 %v555_v53, %v2734_v2 }
 0x171   : > { %v2438_v31 = vpop.eup %2437  ;;  %v879_v60 = vmul.f32 0.7978846, %v815_v30  ;;  %v816_v16 = vadd.f32 %v752_v36, %v3270_v63  ;;  %v753_v55 = vmul.f32 0.044715, %v689_v17  ;;  %v1120_v57 = vmul.f32 %v1056_v22, %v3093_v32 }
 0x172   : > { %v754_v7 = vmul.f32 0.044715, %v690_v50  ;;  %v1122_v61 = vmul.f32 %v1058_v21, %v3118_v5  ;;  %v627_v58 = vmul.f32 %v3299_v8, %v3299_v8  ;;  %v3307_v27 = vadd.f32 %v559_v25, %v2725_v0 }
 0x173   : > { %2447 = vtanh.f32 %v879_v60  ;;  %v880_v52 = vmul.f32 0.7978846, %v816_v16  ;;  %v817_v53 = vadd.f32 %v753_v55, %v3278_v29  ;;  %v3311_v62 = vadd.f32 %v561_v1, %v2734_v2 }
 0x174   : > { %v3313_v28 = vpop.eup %2439  ;;  %v818_v32 = vadd.f32 %v754_v7, %v3284_v33  ;;  %v1164_v19 = vpack.c.bf16 %v1122_v61, %v1120_v57  ;;  %v691_v5 = vmul.f32 %v627_v58, %v3299_v8  ;;  %v628_v21 = vmul.f32 %v3307_v27, %v3307_v27 }
 0x175   : > { %v2442_v30 = vpop.eup %2441  ;;  %2449 = vtanh.f32 %v880_v52  ;;  %v881_v25 = vmul.f32 0.7978846, %v817_v53  ;;  %v629_v16 = vmul.f32 %v3311_v62, %v3311_v62  ;;  %v3322_v36 = vadd.f32 %v563_v20, %v2725_v0 }
 0x176   : > { %v882_v1 = vmul.f32 0.7978846, %v818_v32  ;;  %2200 = vmatprep.mubr.bf16.mxu1 %v1164_v19  ;;  %v755_v17 = vmul.f32 0.044715, %v691_v5  ;;  %v692_v7 = vmul.f32 %v628_v21, %v3307_v27  ;;  %v996_v57 = vadd.f32 1.0, %v3249_v38 }
 0x177   : > { %2451 = vtanh.f32 %v881_v25  ;;  %v693_v22 = vmul.f32 %v629_v16, %v3311_v62  ;;  %v630_v50 = vmul.f32 %v3322_v36, %v3322_v36  ;;  %v998_v60 = vadd.f32 1.0, %v3259_v43 }
 0x178   : > { %v3330_v55 = vpop.eup %2443  ;;  %2453 = vtanh.f32 %v882_v1  ;;  %v819_v0 = vadd.f32 %v755_v17, %v3299_v8  ;;  %v756_v20 = vmul.f32 0.044715, %v692_v7  ;;  %v1060_v61 = vmul.f32 0.5, %v996_v57 }
 0x179   : > { %v757_v58 = vmul.f32 0.044715, %v693_v22  ;;  %v694_v52 = vmul.f32 %v630_v50, %v3322_v36  ;;  %v1062_v53 = vmul.f32 0.5, %v998_v60  ;;  %v3335_v38 = vadd.f32 %v565_v44, %v2734_v2 }
 0x17a   : > { %v2446_v32 = vpop.eup %2445  ;;  %v883_v19 = vmul.f32 0.7978846, %v819_v0  ;;  %v820_v5 = vadd.f32 %v756_v20, %v3307_v27  ;;  %v1124_v43 = vmul.f32 %v1060_v61, %v3143_v37  ;;  %v1000_v21 = vadd.f32 1.0, %v2434_v46 }
 0x17b   : > { %v821_v25 = vadd.f32 %v757_v58, %v3311_v62  ;;  %v758_v16 = vmul.f32 0.044715, %v694_v52  ;;  %v1126_v1 = vmul.f32 %v1062_v53, %v3154_v9  ;;  %v631_v17 = vmul.f32 %v3335_v38, %v3335_v38 }
 0x17c   : > { %2455 = vtanh.f32 %v883_v19  ;;  %v884_v7 = vmul.f32 0.7978846, %v820_v5  ;;  %v1002_v57 = vadd.f32 1.0, %v2438_v31  ;;  %v1064_v2 = vmul.f32 0.5, %v1000_v21 }
 0x17d   : > { %v3343_v44 = vpop.eup %2447  ;;  %v885_v22 = vmul.f32 0.7978846, %v821_v25  ;;  %v822_v50 = vadd.f32 %v758_v16, %v3322_v36  ;;  %v1166_v60 = vpack.c.bf16 %v1126_v1, %v1124_v43  ;;  %v695_v37 = vmul.f32 %v631_v17, %v3335_v38 }
 0x17e   : > { %2457 = vtanh.f32 %v884_v7  ;;  %v1066_v46 = vmul.f32 0.5, %v1002_v57  ;;  %v1128_v0 = vmul.f32 %v1064_v2, %v3194_v3  ;;  %v1004_v9 = vadd.f32 1.0, %v2442_v30 }
 0x17f   : > { %v2450_v20 = vpop.eup %2449  ;;  %2459 = vtanh.f32 %v885_v22  ;;  %v886_v61 = vmul.f32 0.7978846, %v822_v50  ;;  %2201 = vmatmul.mubr.bf16.gmra.mrb[16].mxu1 %v1166_v60  ;;  %v759_v58 = vmul.f32 0.044715, %v695_v37  ;;  %v1006_v31 = vadd.f32 1.0, %v2446_v32 }
 0x180   : > { %v1130_v52 = vmul.f32 %v1066_v46, %v3208_v26  ;;  %v1068_v53 = vmul.f32 0.5, %v1004_v9  ;;  %v1008_v19 = vadd.f32 1.0, %v2450_v20  ;;  %v955_v5 = vadd.f32 1.0, %v2835_v47 }
 0x181   : > { %v3350_v43 = vpop.eup %2451  ;;  %2461 = vtanh.f32 %v886_v61  ;;  %v823_v21 = vadd.f32 %v759_v58, %v3335_v38  ;;  %v1070_v25 = vmul.f32 0.5, %v1006_v31  ;;  %v1017_v3 = vmul.f32 0.5, %v2821_v35 }
 0x182   : > { %v2454_v30 = vpop.eup %2453  ;;  %v1168_v16 = vpack.c.bf16 %v1130_v52, %v1128_v0  ;;  %v1132_v1 = vmul.f32 %v1068_v53, %v3224_v13  ;;  %v1072_v17 = vmul.f32 0.5, %v1008_v19  ;;  %v1019_v32 = vmul.f32 0.5, %v955_v5 }
 0x183   : > { %v887_v7 = vmul.f32 0.7978846, %v823_v21  ;;  %v1134_v26 = vmul.f32 %v1070_v25, %v3247_v49  ;;  %v1010_v57 = vadd.f32 1.0, %v2454_v30  ;;  %v3357_v47 = vmul.f32 %v1017_v3, %v2741_v6 }
 0x184   : > { %2204 = vmatprep.mubr.bf16.mxu1 %v1168_v16  ;;  %v1136_v2 = vmul.f32 %v1072_v17, %v3270_v63  ;;  %v3361_v22 = vmul.f32 %v1019_v32, %v2751_v12  ;;  %v961_v35 = vadd.f32 1.0, %v2878_v59  ;;  %v963_v50 = vadd.f32 1.0, %v2890_v4 }
 0x185   : > { %2463 = vtanh.f32 %v887_v7  ;;  %v1170_v13 = vpack.c.bf16 %v1134_v26, %v1132_v1  ;;  %v1074_v60 = vmul.f32 0.5, %v1010_v57  ;;  %v965_v37 = vadd.f32 1.0, %v2926_v54  ;;  %v3774_v7 = vld [vmem:[#allocation8_spill] sm:$0xff] }
 0x186   : > { %v3366_v49 = vpop.eup %2455  ;;  %v1145_v6 = vpack.c.bf16 %v3361_v22, %v3357_v47  ;;  %v1025_v46 = vmul.f32 0.5, %v961_v35  ;;  %v1027_v0 = vmul.f32 0.5, %v963_v50  ;;  %v967_v63 = vadd.f32 1.0, %v2930_v18  ;;  %v3775_v35 = vld [vmem:[#allocation9_spill] sm:$0xff] }
 0x187   : > { %2205 = vmatmul.mubr.bf16.gmra.mrb[20].mxu1 %v1170_v13  ;;  %v1138_v12 = vmul.f32 %v1074_v60, %v3284_v33  ;;  %v1029_v59 = vmul.f32 0.5, %v965_v37  ;;  %v969_v4 = vadd.f32 1.0, %v2977_v45  ;;  %v971_v9 = vadd.f32 1.0, %v2985_v23  ;;  %v3777_v13 = vld [vmem:[#allocation19_spill] sm:$0xff] }
 0x188   : > { %v2458_v20 = vpop.eup %2457  ;;  %v3375_v54 = vmul.f32 %v1025_v46, %v2795_v56  ;;  %v3378_v61 = vmul.f32 %v1027_v0, %v2807_v11  ;;  %v1031_v58 = vmul.f32 0.5, %v967_v63  ;;  %v973_v31 = vadd.f32 1.0, %v2992_v40  ;;  %v3778_v0 = vld [vmem:[#allocation22_spill] sm:$0xff] }
 0x189   : > { %v3381_v52 = vpop.eup %2459  ;;  %v1172_v18 = vpack.c.bf16 %v1138_v12, %v1136_v2  ;;  %v1012_v53 = vadd.f32 1.0, %v2458_v20  ;;  %v3384_v33 = vmul.f32 %v1029_v59, %v2825_v39  ;;  %v1033_v45 = vmul.f32 0.5, %v969_v4  ;;  %v3779_v12 = vld [vmem:[#allocation10_spill] sm:$0xff] }
 0x18a   : > { %v1149_v23 = vpack.c.bf16 %v3378_v61, %v3375_v54  ;;  %v3389_v56 = vmul.f32 %v1031_v58, %v2841_v51  ;;  %v1035_v19 = vmul.f32 0.5, %v971_v9  ;;  %v975_v11 = vadd.f32 1.0, %v3008_v14  ;;  %v3780_v9 = vld [vmem:[#allocation23_spill] sm:$0xff] }
 0x18b   : > { %v2462_v5 = vpop.eup %2461  ;;  %2208 = vmatprep.mubr.bf16.mxu1 %v1172_v18  ;;  %v1076_v40 = vmul.f32 0.5, %v1012_v53  ;;  %v3393_v21 = vmul.f32 %v1033_v45, %v2873_v24  ;;  %v1037_v25 = vmul.f32 0.5, %v973_v31  ;;  %v977_v39 = vadd.f32 1.0, %v3034_v34  ;;  %v3781_v31 = vld [vmem:[#allocation11_spill] sm:$0xff]  ;;  %v3782_v45 = vld [vmem:[#allocation25_spill] sm:$0xff] }
 0x18c   : > { %v1014_v3 = vadd.f32 1.0, %v2462_v5  ;;  %v1151_v30 = vpack.c.bf16 %v3389_v56, %v3384_v33  ;;  %v3399_v16 = vmul.f32 %v1035_v19, %v2888_v15  ;;  %v1039_v51 = vmul.f32 0.5, %v975_v11  ;;  %v3783_v11 = vld [vmem:[#allocation12_spill] sm:$0xff] }
 0x18d   : > { %v1140_v1 = vmul.f32 %v1076_v40, %v3307_v27  ;;  %v3403_v14 = vmul.f32 %v1037_v25, %v2896_v10  ;;  %v979_v17 = vadd.f32 1.0, %v3045_v48  ;;  %v1041_v24 = vmul.f32 0.5, %v977_v39  ;;  %v3776_v27 = vld [vmem:[#allocation18_spill] sm:$0xff]  ;;  %v3784_v40 = vld [vmem:[#allocation13_spill] sm:$0xff] }
 0x18e   : > { %v1078_v32 = vmul.f32 0.5, %v1014_v3  ;;  %v1153_v34 = vpack.c.bf16 %v3399_v16, %v3393_v21  ;;  %v3409_v26 = vmul.f32 %v1039_v51, %v3774_v7  ;;  %v981_v57 = vadd.f32 1.0, %v3066_v41  ;;  %v3785_v3 = vld [vmem:[#allocation14_spill] sm:$0xff] }
 0x18f   : > { %v2464_v15 = vpop.eup %2463  ;;  %v1043_v2 = vmul.f32 0.5, %v979_v17  ;;  %v3413_v50 = vmul.f32 %v1041_v24, %v3775_v35  ;;  %v983_v10 = vadd.f32 1.0, %v3776_v27  ;;  %v985_v60 = vadd.f32 1.0, %v3777_v13  ;;  %v3786_v24 = vld [vmem:[#allocation27_spill] sm:$0xff] }
 0x190   : > { %v1142_v48 = vmul.f32 %v1078_v32, %v3322_v36  ;;  %v1155_v37 = vpack.c.bf16 %v3409_v26, %v3403_v14  ;;  %v1045_v46 = vmul.f32 0.5, %v981_v57  ;;  %v987_v63 = vadd.f32 1.0, %v3778_v0  ;;  %v3787_v32 = vld [vmem:[#allocation30_spill] sm:$0xff] }
 0x191   : > { %v3422_v59 = vmul.f32 %v1043_v2, %v3779_v12  ;;  %v1047_v41 = vmul.f32 0.5, %v983_v10  ;;  %v1049_v4 = vmul.f32 0.5, %v985_v60  ;;  %v989_v20 = vadd.f32 1.0, %v3780_v9  ;;  %v3788_v2 = vld [vmem:[#allocation15_spill] sm:$0xff]  ;;  %v3790_v10 = vld [vmem:[#allocation32_spill] sm:$0xff] }
 0x192   : > { %v1174_v58 = vpack.c.bf16 %v1142_v48, %v1140_v1  ;;  %v3426_v18 = vmul.f32 %v1045_v46, %v3781_v31  ;;  %v1051_v53 = vmul.f32 0.5, %v987_v63  ;;  %v991_v36 = vadd.f32 1.0, %v3782_v45  ;;  %v3791_v48 = vld [vmem:[#allocation16_spill] sm:$0xff] }
 0x193   : > { %v1157_v19 = vpack.c.bf16 %v3422_v59, %v3413_v50  ;;  %v1111_v5 = vmul.f32 %v1047_v41, %v3783_v11  ;;  %v1113_v25 = vmul.f32 %v1049_v4, %v3784_v40  ;;  %v1053_v39 = vmul.f32 0.5, %v989_v20  ;;  %v3789_v50 = vld [vmem:[#allocation31_spill] sm:$0xff]  ;;  %v3792_v41 = vld [vmem:[#allocation33_spill] sm:$0xff]  ;;  %v3794_v20 = vld [vmem:[#allocation20_spill] sm:$0xff] }
 0x194   : > { %2209 = vmatmul.mubr.bf16.gmra.mrb[24].mxu1 %v1174_v58  ;;  %v1115_v51 = vmul.f32 %v1051_v53, %v3785_v3  ;;  %v1055_v17 = vmul.f32 0.5, %v991_v36  ;;  %v993_v1 = vadd.f32 1.0, %v3786_v24  ;;  %v995_v7 = vadd.f32 1.0, %v3787_v32  ;;  %v3796_v45 = vld [vmem:[#allocation24_spill] sm:$0xff] }
 0x195   : > { %2228 = vmatprep.mubr.bf16.mxu1 %v1145_v6  ;;  %v1159_v57 = vpack.c.bf16 %v1111_v5, %v3426_v18  ;;  %v1117_v35 = vmul.f32 %v1053_v39, %v3788_v2  ;;  %v997_v27 = vadd.f32 1.0, %v3789_v50  ;;  %v999_v13 = vadd.f32 1.0, %v3790_v10  ;;  %v3793_v6 = vld [vmem:[#allocation17_spill] sm:$0xff]  ;;  %v3798_v24 = vld [vmem:[#allocation28_spill] sm:$0xff] }
 0x196   : > { %v1161_v60 = vpack.c.bf16 %v1115_v51, %v1113_v25  ;;  %v1119_v46 = vmul.f32 %v1055_v17, %v3791_v48  ;;  %v1057_v0 = vmul.f32 0.5, %v993_v1  ;;  %v1059_v63 = vmul.f32 0.5, %v995_v7  ;;  %v3795_v18 = vld [vmem:[#allocation21_spill] sm:$0xff]  ;;  %v3797_v51 = vld [vmem:[#allocation26_spill] sm:$0xff] }
 0x197   : > { %v1061_v12 = vmul.f32 0.5, %v997_v27  ;;  %v1063_v59 = vmul.f32 0.5, %v999_v13  ;;  %v1001_v4 = vadd.f32 1.0, %v3792_v41  ;;  %v1003_v47 = vadd.f32 1.0, %v3313_v28  ;;  %v3800_v7 = vld [vmem:[#allocation6_spill] sm:$0xff]  ;;  %v3802_v13 = vld [vmem:[#allocation29_spill] sm:$0xff] }
 0x198   : > { %v1163_v22 = vpack.c.bf16 %v1119_v46, %v1117_v35  ;;  %v1121_v9 = vmul.f32 %v1057_v0, %v3793_v6  ;;  %v1123_v58 = vmul.f32 %v1059_v63, %v3794_v20  ;;  %v1005_v31 = vadd.f32 1.0, %v3330_v55  ;;  %v3799_v55 = vld [vmem:[#allocation7_spill] sm:$0xff] }
 0x199   : > { %v1125_v53 = vmul.f32 %v1061_v12, %v3795_v18  ;;  %v1127_v36 = vmul.f32 %v1063_v59, %v3796_v45  ;;  %v1065_v11 = vmul.f32 0.5, %v1001_v4  ;;  %v1067_v5 = vmul.f32 0.5, %v1003_v47 }
 0x19a   : > { %v1165_v40 = vpack.c.bf16 %v1123_v58, %v1121_v9  ;;  %v1007_v25 = vadd.f32 1.0, %v3343_v44  ;;  %v1069_v39 = vmul.f32 0.5, %v1005_v31  ;;  %v1009_v3 = vadd.f32 1.0, %v3350_v43 }
 0x19b   : > { %v1167_v28 = vpack.c.bf16 %v1127_v36, %v1125_v53  ;;  %v1129_v17 = vmul.f32 %v1065_v11, %v3797_v51  ;;  %v1131_v1 = vmul.f32 %v1067_v5, %v3798_v24  ;;  %v1011_v32 = vadd.f32 1.0, %v3366_v49  ;;  %v1626_v36 = vld [vmem:[%s3719_s5] sm:$0x3] }
 0x19c   : > { %v3801_v2 = vpack.c.bf16 %v3799_v55, %v3800_v7  ;;  %v1071_v35 = vmul.f32 0.5, %v1007_v25  ;;  %v1073_v50 = vmul.f32 0.5, %v1009_v3  ;;  %v1013_v27 = vadd.f32 1.0, %v3381_v52 }
 0x19d   : > { %v1169_v44 = vpack.c.bf16 %v1131_v1, %v1129_v17  ;;  %v1075_v43 = vmul.f32 0.5, %v1011_v32  ;;  %v1015_v10 = vadd.f32 1.0, %v2464_v15  ;;  %v1133_v48 = vmul.f32 %v1069_v39, %v3802_v13 }
 0x19e   : > { %2229 = vmatmul.mubr.bf16.vlgmr.msra.gmra.mrb[28].mxu1 %v3801_v2  ;;  %v1135_v46 = vmul.f32 %v1071_v35, %v3263_v42  ;;  %v1077_v49 = vmul.f32 0.5, %v1013_v27  ;;  %v1137_v0 = vmul.f32 %v1073_v50, %v3278_v29 }
 0x19f   : > { %2232 = vmatprep.mubr.bf16.mxu1 %v1149_v23  ;;  %v1139_v63 = vmul.f32 %v1075_v43, %v3299_v8  ;;  %v1079_v12 = vmul.f32 0.5, %v1015_v10 }
 0x1a0   : > { %v1171_v59 = vpack.c.bf16 %v1135_v46, %v1133_v48  ;;  %v1141_v52 = vmul.f32 %v1077_v49, %v3311_v62 }
 0x1a1   : > { %v1173_v41 = vpack.c.bf16 %v1139_v63, %v1137_v0  ;;  %v1143_v54 = vmul.f32 %v1079_v12, %v3335_v38 }
 0x1a3   : > { %v1175_v61 = vpack.c.bf16 %v1143_v54, %v1141_v52 }
 0x1a6   : > { %2233 = vmatmul.mubr.bf16.gmra.mrb[32].mxu1 %v1151_v30 }
 0x1a7   : > { %2236 = vmatprep.mubr.bf16.mxu1 %v1153_v34 }
 0x1ae   : > { %2237 = vmatmul.mubr.bf16.gmra.mrb[36].mxu1 %v1155_v37 }
 0x1af   : > { %2240 = vmatprep.mubr.bf16.mxu1 %v1157_v19 }
 0x1b6   : > { %2241 = vmatmul.mubr.bf16.gmra.mrb[40].mxu1 %v1159_v57 }
 0x1b7   : > { %2244 = vmatprep.mubr.bf16.mxu1 %v1161_v60 }
 0x1be   : > { %2245 = vmatmul.mubr.bf16.gmra.mrb[44].mxu1 %v1163_v22 }
 0x1bf   : > { %2248 = vmatprep.mubr.bf16.mxu1 %v1165_v40  ;;  %v3803_v40 = vld [vmem:[#allocation5_spill] sm:$0xff] }
 0x1c0   : > { %v3804_v25 = vsub.s32 0, %v3803_v40  ;;  %v3805_v3 = vsub.s32 1, %v3803_v40 }
 0x1c2   : > { %v3532_v39 = vrot.slane %v1626_v36, %v3804_v25 }
 0x1c6   : > { %2249 = vmatmul.mubr.bf16.gmra.mrb[48].mxu1 %v1167_v28  ;;  %v3536_v28 = vrot.slane %v1626_v36, %v3805_v3 }
 0x1c7   : > { %2252 = vmatprep.mubr.bf16.mxu1 %v1169_v44 }
 0x1ce   : > { %2253 = vmatmul.mubr.bf16.gmra.mrb[52].mxu1 %v1171_v59 }
 0x1cf   : > { %2256 = vmatprep.mubr.bf16.mxu1 %v1173_v41 }
 0x1d6   : > { %2257 = vmatmul.mubr.bf16.gmra.mrb[56].mxu1 %v1175_v61 }
 0x1ef   : > { %v2182_v42 = vpop.f32.mrb[64].mxu0 }
 0x1f0   : > { %v1274_v29 = vpop.f32.mrb[65].mxu0  ;;  %v1642_v17 = vadd.f32 %v2182_v42, %v3532_v39 }
 0x1f1   : > { %v2183_v8 = vpop.f32.mrb[66].mxu0  ;;  %v1638_v32 = vadd.f32 %v3532_v39, %v1274_v29 }
 0x1f2   : > { %v1277_v62 = vpop.f32.mrb[67].mxu0  ;;  %v1644_v2 = vadd.f32 %v2183_v8, %v3532_v39 }
 0x1f3   : > { %v1640_v44 = vadd.f32 %v3532_v39, %v1277_v62 }
 0x213   : > { %v2186_v38 = vpop.f32.mrb[0].mxu1 }
 0x214   : > { %v1290_v33 = vpop.f32.mrb[1].mxu1  ;;  %v1650_v49 = vadd.f32 %v2186_v38, %v3532_v39 }
 0x215   : > { %v2187_v23 = vpop.f32.mrb[2].mxu1  ;;  %v1646_v12 = vadd.f32 %v3532_v39, %v1290_v33 }
 0x216   : > { %v1293_v56 = vpop.f32.mrb[3].mxu1  ;;  %v1652_v52 = vadd.f32 %v2187_v23, %v3532_v39 }
 0x217   : > { %v1648_v29 = vadd.f32 %v3532_v39, %v1293_v56 }
 0x21e   : > { %v3478_v21 = vpop.f32.mrb[4].mxu1 }
 0x21f   : > { %v3480_v30 = vpop.f32.mrb[5].mxu1  ;;  %v1658_v23 = vadd.f32 %v3478_v21, %v3532_v39 }
 0x220   : > { %v3482_v16 = vpop.f32.mrb[6].mxu1  ;;  %v1654_v56 = vadd.f32 %v3532_v39, %v3480_v30 }
 0x221   : > { %v3484_v14 = vpop.f32.mrb[7].mxu1 }
 0x222   : > { %v1656_v21 = vadd.f32 %v3532_v39, %v3484_v14 }
 0x22e   : > { %v3486_v34 = vpop.f32.mrb[8].mxu1 }
 0x22f   : > { %v3488_v26 = vpop.f32.mrb[9].mxu1 }
 0x230   : > { %v3490_v15 = vpop.f32.mrb[10].mxu1  ;;  %v1662_v14 = vadd.f32 %v3532_v39, %v3488_v26 }
 0x231   : > { %v3492_v37 = vpop.f32.mrb[11].mxu1 }
 0x241   : > { %v3494_v19 = vpop.f32.mrb[12].mxu1 }
 0x242   : > { %v3496_v57 = vpop.f32.mrb[13].mxu1 }
 0x243   : > { %v3498_v60 = vpop.f32.mrb[14].mxu1 }
 0x244   : > { %v3500_v4 = vpop.f32.mrb[15].mxu1 }
 0x252   : > { %v3502_v47 = vpop.f32.mrb[16].mxu1 }
 0x253   : > { %v3504_v22 = vpop.f32.mrb[17].mxu1 }
 0x254   : > { %v3506_v6 = vpop.f32.mrb[18].mxu1 }
 0x255   : > { %v3508_v9 = vpop.f32.mrb[19].mxu1 }
 0x25a   : > { %v3510_v20 = vpop.f32.mrb[20].mxu1 }
 0x25b   : > { %v3512_v58 = vpop.f32.mrb[21].mxu1 }
 0x25c   : > { %v3514_v31 = vpop.f32.mrb[22].mxu1 }
 0x25d   : > { %v3516_v18 = vpop.f32.mrb[23].mxu1 }
 0x267   : > { %v3518_v53 = vpop.f32.mrb[24].mxu1 }
 0x268   : > { %v3520_v45 = vpop.f32.mrb[25].mxu1 }
 0x269   : > { %v3525_v11 = vpop.f32.mrb[26].mxu1 }
 0x26a   : > { %v3527_v5 = vpop.f32.mrb[27].mxu1 }
 0x271   : > { %v2230_v51 = vpop.f32.mrb[28].mxu1 }
 0x272   : > { %v1643_v24 = vadd.f32 %v2230_v51, %v3536_v28  ;;  %v1499_v1 = vpop.f32.mrb[29].mxu1 }
 0x273   : > { %v1639_v55 = vadd.f32 %v3536_v28, %v1499_v1  ;;  %v2231_v7 = vpop.f32.mrb[30].mxu1 }
 0x274   : > { %v2084_v35 = vpack.c.bf16 %v1643_v24, %v1642_v17  ;;  %v1645_v50 = vadd.f32 %v2231_v7, %v3536_v28  ;;  %v1502_v27 = vpop.f32.mrb[31].mxu1  ;;  %v1660_v17 = vadd.f32 %v3482_v16, %v3532_v39  ;;  %v1666_v16 = vadd.f32 %v3486_v34, %v3532_v39 }
 0x275   : > { %v2082_v43 = vpack.c.bf16 %v1639_v55, %v1638_v32  ;;  %v1641_v10 = vadd.f32 %v3536_v28, %v1502_v27  ;;  %v1664_v34 = vadd.f32 %v3532_v39, %v3492_v37  ;;  %v1670_v37 = vadd.f32 %v3532_v39, %v3496_v57 }
 0x276   : > { %1896 = vst [vmem:[%s3548_s11 + $0x10] sm:$0xff] %v2084_v35  ;;  %v2085_v13 = vpack.c.bf16 %v1645_v50, %v1644_v2 }
 0x277   : > { %1894 = vst [vmem:[%s3548_s11] sm:$0xff] %v2082_v43  ;;  %v2083_v48 = vpack.c.bf16 %v1641_v10, %v1640_v44  ;;  %v1668_v10 = vadd.f32 %v3490_v15, %v3532_v39  ;;  %v1674_v15 = vadd.f32 %v3494_v19, %v3532_v39  ;;  %v1672_v19 = vadd.f32 %v3532_v39, %v3500_v4 }
 0x278   : > { %1897 = vst [vmem:[%s3548_s11 + $0x18] sm:$0xff] %v2085_v13  ;;  %v1678_v4 = vadd.f32 %v3532_v39, %v3504_v22 }
 0x279   : > { %1895 = vst [vmem:[%s3548_s11 + $0x8] sm:$0xff] %v2083_v48  ;;  %v2234_v46 = vpop.f32.mrb[32].mxu1 }
 0x27a   : > { %v1651_v0 = vadd.f32 %v2234_v46, %v3536_v28  ;;  %v1515_v63 = vpop.f32.mrb[33].mxu1 }
 0x27b   : > { %v1647_v59 = vadd.f32 %v3536_v28, %v1515_v63  ;;  %v2235_v41 = vpop.f32.mrb[34].mxu1 }
 0x27c   : > { %v2088_v54 = vpack.c.bf16 %v1651_v0, %v1650_v49  ;;  %v1653_v61 = vadd.f32 %v2235_v41, %v3536_v28  ;;  %v1518_v42 = vpop.f32.mrb[35].mxu1 }
 0x27d   : > { %v2086_v8 = vpack.c.bf16 %v1647_v59, %v1646_v12  ;;  %v1649_v62 = vadd.f32 %v3536_v28, %v1518_v42 }
 0x27e   : > { %1900 = vst [vmem:[%s3548_s11 + $0x30] sm:$0xff] %v2088_v54  ;;  %v2089_v38 = vpack.c.bf16 %v1653_v61, %v1652_v52  ;;  %v1676_v61 = vadd.f32 %v3498_v60, %v3532_v39  ;;  %v1682_v60 = vadd.f32 %v3502_v47, %v3532_v39  ;;  %v1680_v47 = vadd.f32 %v3532_v39, %v3508_v9 }
 0x27f   : > { %1898 = vst [vmem:[%s3548_s11 + $0x20] sm:$0xff] %v2086_v8  ;;  %v2087_v36 = vpack.c.bf16 %v1649_v62, %v1648_v29  ;;  %v1686_v9 = vadd.f32 %v3532_v39, %v3512_v58 }
 0x280   : > { %1901 = vst [vmem:[%s3548_s11 + $0x38] sm:$0xff] %v2089_v38 }
 0x281   : > { %1899 = vst [vmem:[%s3548_s11 + $0x28] sm:$0xff] %v2087_v36  ;;  %v2238_v33 = vpop.f32.mrb[36].mxu1 }
 0x282   : > { %v1659_v40 = vadd.f32 %v2238_v33, %v3536_v28  ;;  %v1531_v25 = vpop.f32.mrb[37].mxu1 }
 0x283   : > { %v1655_v3 = vadd.f32 %v3536_v28, %v1531_v25  ;;  %v2239_v51 = vpop.f32.mrb[38].mxu1 }
 0x284   : > { %v2092_v24 = vpack.c.bf16 %v1659_v40, %v1658_v23  ;;  %v1661_v1 = vadd.f32 %v2239_v51, %v3536_v28  ;;  %v1534_v32 = vpop.f32.mrb[39].mxu1 }
 0x285   : > { %v2090_v55 = vpack.c.bf16 %v1655_v3, %v1654_v56  ;;  %v1657_v7 = vadd.f32 %v3536_v28, %v1534_v32  ;;  %v1684_v3 = vadd.f32 %v3506_v6, %v3532_v39  ;;  %v1690_v6 = vadd.f32 %v3510_v20, %v3532_v39 }
 0x286   : > { %1904 = vst [vmem:[%s3548_s11 + $0x50] sm:$0xff] %v2092_v24  ;;  %v2093_v2 = vpack.c.bf16 %v1661_v1, %v1660_v17  ;;  %v1688_v20 = vadd.f32 %v3532_v39, %v3516_v18  ;;  %v1694_v18 = vadd.f32 %v3532_v39, %v3520_v45  ;;  %v1696_v45 = vadd.f32 %v3532_v39, %v3527_v5 }
 0x287   : > { %1902 = vst [vmem:[%s3548_s11 + $0x40] sm:$0xff] %v2090_v55  ;;  %v2091_v30 = vpack.c.bf16 %v1657_v7, %v1656_v21 }
 0x288   : > { %1905 = vst [vmem:[%s3548_s11 + $0x58] sm:$0xff] %v2093_v2 }
 0x289   : > { %1903 = vst [vmem:[%s3548_s11 + $0x48] sm:$0xff] %v2091_v30  ;;  %v2242_v35 = vpop.f32.mrb[40].mxu1 }
 0x28a   : > { %v1667_v50 = vadd.f32 %v2242_v35, %v3536_v28  ;;  %v1547_v27 = vpop.f32.mrb[41].mxu1 }
 0x28b   : > { %v1663_v44 = vadd.f32 %v3536_v28, %v1547_v27  ;;  %v2243_v43 = vpop.f32.mrb[42].mxu1 }
 0x28c   : > { %v2096_v13 = vpack.c.bf16 %v1667_v50, %v1666_v16  ;;  %v1669_v48 = vadd.f32 %v2243_v43, %v3536_v28  ;;  %v1550_v46 = vpop.f32.mrb[43].mxu1  ;;  %v1692_v16 = vadd.f32 %v3514_v31, %v3532_v39  ;;  %v1698_v31 = vadd.f32 %v3518_v53, %v3532_v39 }
 0x28d   : > { %v2094_v49 = vpack.c.bf16 %v1663_v44, %v1662_v14  ;;  %v1665_v0 = vadd.f32 %v3536_v28, %v1550_v46 }
 0x28e   : > { %1908 = vst [vmem:[%s3548_s11 + $0x70] sm:$0xff] %v2096_v13  ;;  %v2097_v63 = vpack.c.bf16 %v1669_v48, %v1668_v10 }
 0x28f   : > { %1906 = vst [vmem:[%s3548_s11 + $0x60] sm:$0xff] %v2094_v49  ;;  %v2095_v26 = vpack.c.bf16 %v1665_v0, %v1664_v34  ;;  %v1700_v0 = vadd.f32 %v3525_v11, %v3532_v39 }
 0x290   : > { %1909 = vst [vmem:[%s3548_s11 + $0x78] sm:$0xff] %v2097_v63 }
 0x291   : > { %1907 = vst [vmem:[%s3548_s11 + $0x68] sm:$0xff] %v2095_v26  ;;  %v2246_v12 = vpop.f32.mrb[44].mxu1 }
 0x292   : > { %v1675_v59 = vadd.f32 %v2246_v12, %v3536_v28  ;;  %v1563_v41 = vpop.f32.mrb[45].mxu1 }
 0x293   : > { %v1671_v52 = vadd.f32 %v3536_v28, %v1563_v41  ;;  %v2247_v54 = vpop.f32.mrb[46].mxu1 }
 0x294   : > { %v2100_v42 = vpack.c.bf16 %v1675_v59, %v1674_v15  ;;  %v1677_v29 = vadd.f32 %v2247_v54, %v3536_v28  ;;  %v1566_v8 = vpop.f32.mrb[47].mxu1 }
 0x295   : > { %v2098_v62 = vpack.c.bf16 %v1671_v52, %v1670_v37  ;;  %v1673_v38 = vadd.f32 %v3536_v28, %v1566_v8 }
 0x296   : > { %1912 = vst [vmem:[%s3548_s11 + $0x90] sm:$0xff] %v2100_v42  ;;  %v2101_v36 = vpack.c.bf16 %v1677_v29, %v1676_v61 }
 0x297   : > { %1910 = vst [vmem:[%s3548_s11 + $0x80] sm:$0xff] %v2098_v62  ;;  %v2099_v57 = vpack.c.bf16 %v1673_v38, %v1672_v19 }
 0x298   : > { %1913 = vst [vmem:[%s3548_s11 + $0x98] sm:$0xff] %v2101_v36 }
 0x299   : > { %1911 = vst [vmem:[%s3548_s11 + $0x88] sm:$0xff] %v2099_v57  ;;  %v2250_v33 = vpop.f32.mrb[48].mxu1 }
 0x29a   : > { %v1683_v23 = vadd.f32 %v2250_v33, %v3536_v28  ;;  %v1579_v40 = vpop.f32.mrb[49].mxu1 }
 0x29b   : > { %v1679_v25 = vadd.f32 %v3536_v28, %v1579_v40  ;;  %v2251_v56 = vpop.f32.mrb[50].mxu1 }
 0x29c   : > { %v2104_v51 = vpack.c.bf16 %v1683_v23, %v1682_v60  ;;  %v1685_v17 = vadd.f32 %v2251_v56, %v3536_v28  ;;  %v1582_v24 = vpop.f32.mrb[51].mxu1 }
 0x29d   : > { %v2102_v1 = vpack.c.bf16 %v1679_v25, %v1678_v4  ;;  %v1681_v32 = vadd.f32 %v3536_v28, %v1582_v24 }
 0x29e   : > { %1916 = vst [vmem:[%s3548_s11 + $0xb0] sm:$0xff] %v2104_v51  ;;  %v2105_v21 = vpack.c.bf16 %v1685_v17, %v1684_v3 }
 0x29f   : > { %1914 = vst [vmem:[%s3548_s11 + $0xa0] sm:$0xff] %v2102_v1  ;;  %v2103_v22 = vpack.c.bf16 %v1681_v32, %v1680_v47 }
 0x2a0   : > { %1917 = vst [vmem:[%s3548_s11 + $0xb8] sm:$0xff] %v2105_v21 }
 0x2a1   : > { %1915 = vst [vmem:[%s3548_s11 + $0xa8] sm:$0xff] %v2103_v22  ;;  %v2254_v55 = vpop.f32.mrb[52].mxu1 }
 0x2a2   : > { %v1691_v7 = vadd.f32 %v2254_v55, %v3536_v28  ;;  %v1595_v2 = vpop.f32.mrb[53].mxu1 }
 0x2a3   : > { %v1687_v30 = vadd.f32 %v3536_v28, %v1595_v2  ;;  %v2255_v35 = vpop.f32.mrb[54].mxu1 }
 0x2a4   : > { %v2108_v50 = vpack.c.bf16 %v1691_v7, %v1690_v6  ;;  %v1693_v27 = vadd.f32 %v2255_v35, %v3536_v28  ;;  %v1598_v14 = vpop.f32.mrb[55].mxu1 }
 0x2a5   : > { %v2106_v44 = vpack.c.bf16 %v1687_v30, %v1686_v9  ;;  %v1689_v43 = vadd.f32 %v3536_v28, %v1598_v14 }
 0x2a6   : > { %1920 = vst [vmem:[%s3548_s11 + $0xd0] sm:$0xff] %v2108_v50  ;;  %v2109_v58 = vpack.c.bf16 %v1693_v27, %v1692_v16 }
 0x2a7   : > { %1918 = vst [vmem:[%s3548_s11 + $0xc0] sm:$0xff] %v2106_v44  ;;  %v2107_v10 = vpack.c.bf16 %v1689_v43, %v1688_v20 }
 0x2a8   : > { %1921 = vst [vmem:[%s3548_s11 + $0xd8] sm:$0xff] %v2109_v58 }
 0x2a9   : > { %1919 = vst [vmem:[%s3548_s11 + $0xc8] sm:$0xff] %v2107_v10  ;;  %v2258_v13 = vpop.f32.mrb[56].mxu1 }
 0x2aa   : > { %v1699_v48 = vadd.f32 %v2258_v13, %v3536_v28  ;;  %v1611_v46 = vpop.f32.mrb[57].mxu1 }
 0x2ab   : > { %v1695_v34 = vadd.f32 %v3536_v28, %v1611_v46  ;;  %v2259_v49 = vpop.f32.mrb[58].mxu1 }
 0x2ac   : > { %v2112_v63 = vpack.c.bf16 %v1699_v48, %v1698_v31  ;;  %v1701_v53 = vadd.f32 %v2259_v49, %v3536_v28  ;;  %v1614_v26 = vpop.f32.mrb[59].mxu1 }
 0x2ad   : > { %v2110_v12 = vpack.c.bf16 %v1695_v34, %v1694_v18  ;;  %v1697_v15 = vadd.f32 %v3536_v28, %v1614_v26 }
 0x2ae   : > { %1924 = vst [vmem:[%s3548_s11 + $0xf0] sm:$0xff] %v2112_v63  ;;  %v2113_v59 = vpack.c.bf16 %v1701_v53, %v1700_v0 }
 0x2af   : > { %1922 = vst [vmem:[%s3548_s11 + $0xe0] sm:$0xff] %v2110_v12  ;;  %v2111_v11 = vpack.c.bf16 %v1697_v15, %v1696_v45 }
 0x2b0   : > { %1925 = vst [vmem:[%s3548_s11 + $0xf8] sm:$0xff] %v2113_v59 }
 0x2b1   : > { %1923 = vst [vmem:[%s3548_s11 + $0xe8] sm:$0xff] %v2111_v11 }
 0x2b2   : > { %2478 = shalt.err (!%p2475_p3)
}
 0x2b3   : > { %s2479_s26 = scalar_lea.hbm %s3664_s15, 4096  ;;  %s2483_s9 = scalar_lea.hbm %s3720_s6, 8192 }
 0x2b4   : > { %p2480_p4 = scmp.ne.s32.totalorder %s3664_s15, %s2479_s26  ;;  %p2484_p9 = scmp.lt.u32.totalorder %s3664_s15, %s3720_s6 }
 0x2b5   : > { %p2485_p10 = scmp.lt.u32.totalorder %s2483_s9, %s2479_s26  ;;  %p2487_p12 = scmp.lt.u32.totalorder %s2479_s26, %s3664_s15 }
 0x2b6   : > { %p2481_p7 = pnand %p2480_p4, %p2606_p5 }
 0x2b7   : > { %p2486_p11 = por %p2485_p10, %p2484_p9 }
 0x2b8   : > { %p2482_p8 = pneg %p2481_p7 }
 0x2b9   : > { %p2488_p13 = por %p2487_p12, %p2486_p11 }
 0x2bb   : > { %p2489_p0 = pnand %p2488_p13, %p2482_p8 }
 0x2bd   : > { %2492 = shalt.err (!%p2489_p0)
}
 0x2be   : > { %s2531_s12 = smov 128   ;;  %s2532_s25 = smov 8  }
 0x2bf   : > { %2276 = dma.vmem_to_hbm [thread:$0]  (%p2606_p5), %s3666_s13, 4096, %s3664_s15, %s3673_s16, %s2531_s12, %s2531_s12, %s2532_s25  }
 0x2c0 PF: > { %p2282_p1 = scmp.ge.s32.totalorder %s2527_s24, 2  ;;  %s1956_s14 = sand.u32 1, %s2515_s21  }
 0x2c1   : > { %s1957_s18 = scalar_lea.sflag [#allocation3], %s1956_s14 }
 0x2c2   : > { %p2279_p2 = pnand %p2282_p1, %p2610_p6 }
 0x2c4   : > { %2510 = dma.done.wait (!%p2279_p2), %s1957_s18, 4096  }
 0x2c5   : > { %2512 = vsyncadd (!%p2279_p2), %s1957_s18, 4294963200  ;;  %p16_p3 = scmp.ge.s32.totalorder %s2593_s27, 4   ;;  %s3806_s21 = smov %s2519_s22 }
 0x2c6   : > { %s3807_s22 = smov %s2523_s23  ;;  %s3808_s23 = smov %s2604_s30 }
 0x2c7   : > { %s3809_s24 = smov %s2593_s27  ;;  %18 = sbr.rel (!%p16_p3) target bundleno = 3 (0x3), region = 79 }
 0x2ce   :  { %1962 = vsyncpa [#allocation3], 1 }
 0x2cf   :  { %1964 = vsyncpa [#allocation3 + $0x1], 1 }

</bundles_post_ra>
